<compile_context>
chip_gen: v7x
topology: tpu7x:2x2x1
jax: 0.10.0
libtpu: 0.0.40
codegen_flags: <defaults>
</compile_context>

<pallas_src>
import functools
import math

import jax
import jax.numpy as jnp
from jax import lax
from jax.experimental import pallas as pl
from jax.experimental.pallas import tpu as pltpu


# ---------------------------------------------------------------------------
# VMEM budgeting (per-generation: v5e/v6e 128 MiB, v7x 64 MiB physical)
# ---------------------------------------------------------------------------
def _physical_vmem_bytes():
    try:
        cap = getattr(pltpu.get_tpu_info(), "vmem_capacity_bytes", None)
        if cap:
            return int(cap)
    except Exception:
        pass
    return 64 * 1024 * 1024          # conservative default (v7x physical VMEM)


def _pick_co_tile(co, ci, lp, lo, n_batch, budget_bytes):
    """Largest output-channel tile (multiple of 8 dividing co) whose rough
    VMEM footprint fits the budget; nudged so the grid has >= 2 steps."""
    def footprint(ct):
        return (2 * ci * lp * 2          # bf16 input block, double-buffered
                + 2 * 9 * ct * ci * 2    # bf16 tap-major weight block
                + 2 * ct * lo * 4        # output block (f32 worst case), x2
                + ct * lo * 4            # f32 accumulator value
                + 2 * ci * lo * 2)       # ~2 live bf16 tap slices
    cands = [t for t in range(8, co + 1, 8) if co % t == 0] or [co]
    fitting = [t for t in cands if footprint(t) <= budget_bytes]
    ct = max(fitting) if fitting else min(cands)
    if n_batch * (co // ct) < 2:         # keep >=2 grid steps (v7x: 2 TCs)
        smaller = [t for t in cands if t < ct]
        if smaller:
            ct = max(smaller)
    return ct


# ---------------------------------------------------------------------------
# Fused Conv2dBlock kernel: 3x3 conv (9 shifted tap matmuls) + bias
#                           + InstanceNorm(affine) + activation, wide layout.
# ---------------------------------------------------------------------------
def _conv_in_act_kernel(x_ref, w_ref, b_ref, g_ref, be_ref, m_ref, o_ref, *,
                        wp, lo, n_valid, activation):
    # x_ref : (1, Ci, Lp)  bf16  flattened padded input (row stride = wp)
    # w_ref : (9, CT, Ci)  bf16  tap-major weights
    # b_ref, g_ref, be_ref : (CT, 1) f32  bias / IN gamma / IN beta
    # m_ref : (1, Lo)      f32   1.0 at valid output columns, 0.0 at wrap cols
    # o_ref : (1, CT, Lo)        "wide" output (wrap columns zeroed)
    ct = o_ref.shape[1]
    acc = jnp.zeros((ct, lo), jnp.float32)
    for di in range(3):
        for dj in range(3):
            s = di * wp + dj
            tap = x_ref[0, :, s:s + lo]                        # (Ci, Lo) bf16
            acc = acc + jnp.dot(w_ref[di * 3 + dj], tap,
                                preferred_element_type=jnp.float32)
    acc = acc + b_ref[...]                                     # bias

    mask = m_ref[...]                                          # (1, Lo)
    inv_n = 1.0 / float(n_valid)
    mean = jnp.sum(acc * mask, axis=-1, keepdims=True) * inv_n
    cen = (acc - mean) * mask
    var = jnp.sum(cen * cen, axis=-1, keepdims=True) * inv_n
    y = (acc - mean) * lax.rsqrt(var + 1e-5)
    y = y * g_ref[...] + be_ref[...]
    if activation == "relu":
        y = jnp.maximum(y, 0.0)
    elif activation == "tanh":
        y = jnp.tanh(y)
    o_ref[0] = (y * mask).astype(o_ref.dtype)                  # zero wrap cols


def conv2d_block_wide(x_flat, w, b, gamma, beta, mask, *, H, W, activation,
                      out_dtype, co_tile, vmem_limit):
    """x_flat: [N, Ci, Lp] bf16 (padded, flattened).  Returns [N, Co, Lo]
    with Lo = H*(W+2); wrap columns are zero."""
    N, Ci, Lp = x_flat.shape
    Co = w.shape[0]
    Wp = W + 2
    Lo = H * Wp

    w_taps = (jnp.transpose(w, (2, 3, 0, 1))
              .reshape(9, Co, Ci).astype(jnp.bfloat16))
    kern = functools.partial(_conv_in_act_kernel, wp=Wp, lo=Lo,
                             n_valid=H * W, activation=activation)
    grid = (N, Co // co_tile)
    return pl.pallas_call(
        kern,
        out_shape=jax.ShapeDtypeStruct((N, Co, Lo), out_dtype),
        grid_spec=pltpu.PrefetchScalarGridSpec(
            num_scalar_prefetch=0,
            grid=grid,
            in_specs=[
                pl.BlockSpec((1, Ci, Lp), lambda n, c: (n, 0, 0)),
                pl.BlockSpec((9, co_tile, Ci), lambda n, c: (0, c, 0)),
                pl.BlockSpec((co_tile, 1), lambda n, c: (c, 0)),
                pl.BlockSpec((co_tile, 1), lambda n, c: (c, 0)),
                pl.BlockSpec((co_tile, 1), lambda n, c: (c, 0)),
                pl.BlockSpec((1, Lo), lambda n, c: (0, 0)),
            ],
            out_specs=pl.BlockSpec((1, co_tile, Lo), lambda n, c: (n, c, 0)),
        ),
        compiler_params=pltpu.CompilerParams(
            dimension_semantics=("parallel", "parallel"),
            vmem_limit_bytes=vmem_limit),
    )(x_flat, w_taps,
      b.reshape(Co, 1).astype(jnp.float32),
      gamma.reshape(Co, 1).astype(jnp.float32),
      beta.reshape(Co, 1).astype(jnp.float32),
      mask)


# ---------------------------------------------------------------------------
# ResBlock forward: Conv2dBlock(IN, relu) -> Conv2dBlock(IN, none) -> +x
# ---------------------------------------------------------------------------
def resblock_forward(params, x, *, pad_type="zero"):
    N, C, H, W = x.shape
    Wp = W + 2
    Lo = H * Wp                       # wide-layout spatial length (Ho=H, Wo=W)
    Lp = (H + 3) * Wp                 # flat padded length (>= (H+2)*Wp + 2)
    mode = "reflect" if pad_type == "reflect" else "constant"

    phys = _physical_vmem_bytes()
    budget = int(phys * 0.55)
    vmem_limit = int(phys * 0.90)
    co_tile = _pick_co_tile(C, C, Lp, Lo, N, budget)

    # 1.0 at valid output columns of the wide layout, 0.0 at the 2 wrap cols.
    mask = (jnp.arange(Lo) % Wp < W).astype(jnp.float32).reshape(1, Lo)

    # ---- block 1: cast bf16 once, pad H by (1,2) / W by (1,1), flatten ----
    x1 = jnp.pad(x.astype(jnp.bfloat16),
                 ((0, 0), (0, 0), (1, 2), (1, 1)), mode=mode)
    x1_flat = x1.reshape(N, C, Lp)
    p1 = params["conv1"]
    out1_wide = conv2d_block_wide(
        x1_flat, p1["w"], p1["b"], p1["gamma"], p1["beta"], mask,
        H=H, W=W, activation="relu", out_dtype=jnp.bfloat16,
        co_tile=co_tile, vmem_limit=vmem_limit)           # [N, C, Lo] bf16

    # ---- block 2 input: masked wide layout already has zeros in the wrap
    # columns, so zero-padding is just a flat shift (no extraction pass). ----
    if pad_type == "zero":
        x2_flat = jnp.pad(out1_wide,
                          ((0, 0), (0, 0), (Wp + 1, Lp - Lo - Wp - 1)))
    else:   # reflect: strip wrap cols, reflect-pad, re-flatten
        out1 = out1_wide.reshape(N, C, H, Wp)[:, :, :, :W]
        x2_flat = jnp.pad(out1, ((0, 0), (0, 0), (1, 2), (1, 1)),
                          mode="reflect").reshape(N, C, Lp)

    p2 = params["conv2"]
    out2_wide = conv2d_block_wide(
        x2_flat, p2["w"], p2["b"], p2["gamma"], p2["beta"], mask,
        H=H, W=W, activation="none", out_dtype=jnp.float32,
        co_tile=co_tile, vmem_limit=vmem_limit)           # [N, C, Lo] f32

    # strip wrap columns and add the residual (exact f32, one fused pass)
    out2 = out2_wide.reshape(N, C, H, Wp)[:, :, :, :W]
    return out2 + x


# ---------------------------------------------------------------------------
# plain-JAX reference (same bf16 operand quantization, f32 accumulation)
# ---------------------------------------------------------------------------
def resblock_reference(params, x, *, pad_type="zero"):
    def block(h, p, activation):
        mode = "reflect" if pad_type == "reflect" else "constant"
        hp = jnp.pad(h, ((0, 0), (0, 0), (1, 1), (1, 1)), mode=mode)
        y = lax.conv_general_dilated(
            hp.astype(jnp.bfloat16), p["w"].astype(jnp.bfloat16),
            window_strides=(1, 1), padding="VALID",
            dimension_numbers=("NCHW", "OIHW", "NCHW"),
            preferred_element_type=jnp.float32)
        y = y + p["b"].reshape(1, -1, 1, 1)
        mean = jnp.mean(y, axis=(2, 3), keepdims=True)
        var = jnp.mean(jnp.square(y - mean), axis=(2, 3), keepdims=True)
        y = (y - mean) * lax.rsqrt(var + 1e-5)
        y = y * p["gamma"].reshape(1, -1, 1, 1) + p["beta"].reshape(1, -1, 1, 1)
        if activation == "relu":
            y = jnp.maximum(y, 0.0)
        return y

    out = block(x, params["conv1"], "relu")
    out = block(out, params["conv2"], "none")
    return out + x


# ---------------------------------------------------------------------------
def init_resblock_params(key, dim):
    def init_conv(k, c_in, c_out, ksz):
        k1, k2, k3, k4 = jax.random.split(k, 4)
        fan_in = c_in * ksz * ksz
        w = (jax.random.normal(k1, (c_out, c_in, ksz, ksz), jnp.float32)
             / math.sqrt(fan_in))
        b = 0.1 * jax.random.normal(k2, (c_out,), jnp.float32)
        gamma = 1.0 + 0.1 * jax.random.normal(k3, (c_out,), jnp.float32)
        beta = 0.1 * jax.random.normal(k4, (c_out,), jnp.float32)
        return dict(w=w, b=b, gamma=gamma, beta=beta)

    k1, k2 = jax.random.split(key)
    return {"conv1": init_conv(k1, dim, dim, 3),
            "conv2": init_conv(k2, dim, dim, 3)}


# ---------------------------------------------------------------------------
if __name__ == "__main__":
    key = jax.random.PRNGKey(0)
    k_in, k_par = jax.random.split(key)

    N, C, H, W = 2, 8, 16, 16          # ResBlock(dim=8), small test shapes
    params = init_resblock_params(k_par, dim=C)
    x = jax.random.normal(k_in, (N, C, H, W), jnp.float32)

    fwd = jax.jit(functools.partial(resblock_forward, pad_type="zero"))
    y = fwd(params, x)
    jax.block_until_ready(y)

    y_ref = resblock_reference(params, x, pad_type="zero")

    assert y.shape == (N, C, H, W), y.shape
    assert bool(jnp.all(jnp.isfinite(y)))
    err = float(jnp.max(jnp.abs(y - y_ref)))
    assert err < 5e-2, f"max abs err vs reference = {err}"
    print("KERNEL_OK")
</pallas_src>

<mosaic_0001>
module attributes {stable_mosaic.version = 11 : i64} {
  func.func @_conv_in_act_kernel(%arg0: i32, %arg1: i32, %arg2: memref<1x8x342xbf16, #tpu.memory_space<vmem>>, %arg3: memref<9x8x8xbf16, #tpu.memory_space<vmem>>, %arg4: memref<8x1xf32, #tpu.memory_space<vmem>>, %arg5: memref<8x1xf32, #tpu.memory_space<vmem>>, %arg6: memref<8x1xf32, #tpu.memory_space<vmem>>, %arg7: memref<1x288xf32, #tpu.memory_space<vmem>>, %arg8: memref<1x8x288xbf16, #tpu.memory_space<vmem>>) attributes {dimension_semantics = [#tpu.dimension_semantics<parallel>, #tpu.dimension_semantics<parallel>], iteration_bounds = array<i64: 2, 1>, scalar_prefetch = 0 : i64, scratch_operands = 0 : i64, tpu.core_type = #tpu.core_type<tc>, window_params = [{transform_indices = @transform_0, window_bounds = array<i64: 1, 8, 342>}, {transform_indices = @transform_1, window_bounds = array<i64: 9, 8, 8>}, {transform_indices = @transform_2, window_bounds = array<i64: 8, 1>}, {transform_indices = @transform_3, window_bounds = array<i64: 8, 1>}, {transform_indices = @transform_4, window_bounds = array<i64: 8, 1>}, {pipeline_mode = #tpu.pipeline_mode<synchronous>, transform_indices = @transform_5, window_bounds = array<i64: 1, 288>}, {transform_indices = @transform_6, window_bounds = array<i64: 1, 8, 288>}]} {
    %cst = arith.constant 0.000000e+00 : f32
    %0 = vector.broadcast %cst : f32 to vector<8x288xf32>
    %c0 = arith.constant 0 : index
    %c0_0 = arith.constant 0 : index
    %c0_1 = arith.constant 0 : index
    %1 = vector.load %arg2[%c0, %c0_0, %c0_1] : memref<1x8x342xbf16, #tpu.memory_space<vmem>>, vector<1x8x288xbf16>
    %2 = vector.shape_cast %1 : vector<1x8x288xbf16> to vector<8x288xbf16>
    %c0_2 = arith.constant 0 : index
    %c0_3 = arith.constant 0 : index
    %c0_4 = arith.constant 0 : index
    %3 = vector.load %arg3[%c0_2, %c0_3, %c0_4] : memref<9x8x8xbf16, #tpu.memory_space<vmem>>, vector<1x8x8xbf16>
    %4 = vector.shape_cast %3 : vector<1x8x8xbf16> to vector<8x8xbf16>
    %cst_5 = arith.constant dense<0.000000e+00> : vector<8x288xf32>
    %5 = tpu.matmul %4, %2, %cst_5 {dimension_numbers = #tpu.dot_dimension_numbers<[1], [0], [0], [1], [0, 0, 1, 1], [], []>} : vector<8x8xbf16>, vector<8x288xbf16>, vector<8x288xf32> -> vector<8x288xf32>
    %6 = arith.addf %0, %5 : vector<8x288xf32>
    %c0_6 = arith.constant 0 : index
    %c0_7 = arith.constant 0 : index
    %c1 = arith.constant 1 : index
    %7 = vector.load %arg2[%c0_6, %c0_7, %c1] : memref<1x8x342xbf16, #tpu.memory_space<vmem>>, vector<1x8x288xbf16>
    %8 = vector.shape_cast %7 : vector<1x8x288xbf16> to vector<8x288xbf16>
    %c1_8 = arith.constant 1 : index
    %c0_9 = arith.constant 0 : index
    %c0_10 = arith.constant 0 : index
    %9 = vector.load %arg3[%c1_8, %c0_9, %c0_10] : memref<9x8x8xbf16, #tpu.memory_space<vmem>>, vector<1x8x8xbf16>
    %10 = vector.shape_cast %9 : vector<1x8x8xbf16> to vector<8x8xbf16>
    %cst_11 = arith.constant dense<0.000000e+00> : vector<8x288xf32>
    %11 = tpu.matmul %10, %8, %cst_11 {dimension_numbers = #tpu.dot_dimension_numbers<[1], [0], [0], [1], [0, 0, 1, 1], [], []>} : vector<8x8xbf16>, vector<8x288xbf16>, vector<8x288xf32> -> vector<8x288xf32>
    %12 = arith.addf %6, %11 : vector<8x288xf32>
    %c0_12 = arith.constant 0 : index
    %c0_13 = arith.constant 0 : index
    %c2 = arith.constant 2 : index
    %13 = vector.load %arg2[%c0_12, %c0_13, %c2] : memref<1x8x342xbf16, #tpu.memory_space<vmem>>, vector<1x8x288xbf16>
    %14 = vector.shape_cast %13 : vector<1x8x288xbf16> to vector<8x288xbf16>
    %c2_14 = arith.constant 2 : index
    %c0_15 = arith.constant 0 : index
    %c0_16 = arith.constant 0 : index
    %15 = vector.load %arg3[%c2_14, %c0_15, %c0_16] : memref<9x8x8xbf16, #tpu.memory_space<vmem>>, vector<1x8x8xbf16>
    %16 = vector.shape_cast %15 : vector<1x8x8xbf16> to vector<8x8xbf16>
    %cst_17 = arith.constant dense<0.000000e+00> : vector<8x288xf32>
    %17 = tpu.matmul %16, %14, %cst_17 {dimension_numbers = #tpu.dot_dimension_numbers<[1], [0], [0], [1], [0, 0, 1, 1], [], []>} : vector<8x8xbf16>, vector<8x288xbf16>, vector<8x288xf32> -> vector<8x288xf32>
    %18 = arith.addf %12, %17 : vector<8x288xf32>
    %c0_18 = arith.constant 0 : index
    %c0_19 = arith.constant 0 : index
    %c18 = arith.constant 18 : index
    %19 = vector.load %arg2[%c0_18, %c0_19, %c18] : memref<1x8x342xbf16, #tpu.memory_space<vmem>>, vector<1x8x288xbf16>
    %20 = vector.shape_cast %19 : vector<1x8x288xbf16> to vector<8x288xbf16>
    %c3 = arith.constant 3 : index
    %c0_20 = arith.constant 0 : index
    %c0_21 = arith.constant 0 : index
    %21 = vector.load %arg3[%c3, %c0_20, %c0_21] : memref<9x8x8xbf16, #tpu.memory_space<vmem>>, vector<1x8x8xbf16>
    %22 = vector.shape_cast %21 : vector<1x8x8xbf16> to vector<8x8xbf16>
    %cst_22 = arith.constant dense<0.000000e+00> : vector<8x288xf32>
    %23 = tpu.matmul %22, %20, %cst_22 {dimension_numbers = #tpu.dot_dimension_numbers<[1], [0], [0], [1], [0, 0, 1, 1], [], []>} : vector<8x8xbf16>, vector<8x288xbf16>, vector<8x288xf32> -> vector<8x288xf32>
    %24 = arith.addf %18, %23 : vector<8x288xf32>
    %c0_23 = arith.constant 0 : index
    %c0_24 = arith.constant 0 : index
    %c19 = arith.constant 19 : index
    %25 = vector.load %arg2[%c0_23, %c0_24, %c19] : memref<1x8x342xbf16, #tpu.memory_space<vmem>>, vector<1x8x288xbf16>
    %26 = vector.shape_cast %25 : vector<1x8x288xbf16> to vector<8x288xbf16>
    %c4 = arith.constant 4 : index
    %c0_25 = arith.constant 0 : index
    %c0_26 = arith.constant 0 : index
    %27 = vector.load %arg3[%c4, %c0_25, %c0_26] : memref<9x8x8xbf16, #tpu.memory_space<vmem>>, vector<1x8x8xbf16>
    %28 = vector.shape_cast %27 : vector<1x8x8xbf16> to vector<8x8xbf16>
    %cst_27 = arith.constant dense<0.000000e+00> : vector<8x288xf32>
    %29 = tpu.matmul %28, %26, %cst_27 {dimension_numbers = #tpu.dot_dimension_numbers<[1], [0], [0], [1], [0, 0, 1, 1], [], []>} : vector<8x8xbf16>, vector<8x288xbf16>, vector<8x288xf32> -> vector<8x288xf32>
    %30 = arith.addf %24, %29 : vector<8x288xf32>
    %c0_28 = arith.constant 0 : index
    %c0_29 = arith.constant 0 : index
    %c20 = arith.constant 20 : index
    %31 = vector.load %arg2[%c0_28, %c0_29, %c20] : memref<1x8x342xbf16, #tpu.memory_space<vmem>>, vector<1x8x288xbf16>
    %32 = vector.shape_cast %31 : vector<1x8x288xbf16> to vector<8x288xbf16>
    %c5 = arith.constant 5 : index
    %c0_30 = arith.constant 0 : index
    %c0_31 = arith.constant 0 : index
    %33 = vector.load %arg3[%c5, %c0_30, %c0_31] : memref<9x8x8xbf16, #tpu.memory_space<vmem>>, vector<1x8x8xbf16>
    %34 = vector.shape_cast %33 : vector<1x8x8xbf16> to vector<8x8xbf16>
    %cst_32 = arith.constant dense<0.000000e+00> : vector<8x288xf32>
    %35 = tpu.matmul %34, %32, %cst_32 {dimension_numbers = #tpu.dot_dimension_numbers<[1], [0], [0], [1], [0, 0, 1, 1], [], []>} : vector<8x8xbf16>, vector<8x288xbf16>, vector<8x288xf32> -> vector<8x288xf32>
    %36 = arith.addf %30, %35 : vector<8x288xf32>
    %c0_33 = arith.constant 0 : index
    %c0_34 = arith.constant 0 : index
    %c36 = arith.constant 36 : index
    %37 = vector.load %arg2[%c0_33, %c0_34, %c36] : memref<1x8x342xbf16, #tpu.memory_space<vmem>>, vector<1x8x288xbf16>
    %38 = vector.shape_cast %37 : vector<1x8x288xbf16> to vector<8x288xbf16>
    %c6 = arith.constant 6 : index
    %c0_35 = arith.constant 0 : index
    %c0_36 = arith.constant 0 : index
    %39 = vector.load %arg3[%c6, %c0_35, %c0_36] : memref<9x8x8xbf16, #tpu.memory_space<vmem>>, vector<1x8x8xbf16>
    %40 = vector.shape_cast %39 : vector<1x8x8xbf16> to vector<8x8xbf16>
    %cst_37 = arith.constant dense<0.000000e+00> : vector<8x288xf32>
    %41 = tpu.matmul %40, %38, %cst_37 {dimension_numbers = #tpu.dot_dimension_numbers<[1], [0], [0], [1], [0, 0, 1, 1], [], []>} : vector<8x8xbf16>, vector<8x288xbf16>, vector<8x288xf32> -> vector<8x288xf32>
    %42 = arith.addf %36, %41 : vector<8x288xf32>
    %c0_38 = arith.constant 0 : index
    %c0_39 = arith.constant 0 : index
    %c37 = arith.constant 37 : index
    %43 = vector.load %arg2[%c0_38, %c0_39, %c37] : memref<1x8x342xbf16, #tpu.memory_space<vmem>>, vector<1x8x288xbf16>
    %44 = vector.shape_cast %43 : vector<1x8x288xbf16> to vector<8x288xbf16>
    %c7 = arith.constant 7 : index
    %c0_40 = arith.constant 0 : index
    %c0_41 = arith.constant 0 : index
    %45 = vector.load %arg3[%c7, %c0_40, %c0_41] : memref<9x8x8xbf16, #tpu.memory_space<vmem>>, vector<1x8x8xbf16>
    %46 = vector.shape_cast %45 : vector<1x8x8xbf16> to vector<8x8xbf16>
    %cst_42 = arith.constant dense<0.000000e+00> : vector<8x288xf32>
    %47 = tpu.matmul %46, %44, %cst_42 {dimension_numbers = #tpu.dot_dimension_numbers<[1], [0], [0], [1], [0, 0, 1, 1], [], []>} : vector<8x8xbf16>, vector<8x288xbf16>, vector<8x288xf32> -> vector<8x288xf32>
    %48 = arith.addf %42, %47 : vector<8x288xf32>
    %c0_43 = arith.constant 0 : index
    %c0_44 = arith.constant 0 : index
    %c38 = arith.constant 38 : index
    %49 = vector.load %arg2[%c0_43, %c0_44, %c38] : memref<1x8x342xbf16, #tpu.memory_space<vmem>>, vector<1x8x288xbf16>
    %50 = vector.shape_cast %49 : vector<1x8x288xbf16> to vector<8x288xbf16>
    %c8 = arith.constant 8 : index
    %c0_45 = arith.constant 0 : index
    %c0_46 = arith.constant 0 : index
    %51 = vector.load %arg3[%c8, %c0_45, %c0_46] : memref<9x8x8xbf16, #tpu.memory_space<vmem>>, vector<1x8x8xbf16>
    %52 = vector.shape_cast %51 : vector<1x8x8xbf16> to vector<8x8xbf16>
    %cst_47 = arith.constant dense<0.000000e+00> : vector<8x288xf32>
    %53 = tpu.matmul %52, %50, %cst_47 {dimension_numbers = #tpu.dot_dimension_numbers<[1], [0], [0], [1], [0, 0, 1, 1], [], []>} : vector<8x8xbf16>, vector<8x288xbf16>, vector<8x288xf32> -> vector<8x288xf32>
    %54 = arith.addf %48, %53 : vector<8x288xf32>
    %c0_48 = arith.constant 0 : index
    %c0_49 = arith.constant 0 : index
    %55 = vector.load %arg4[%c0_48, %c0_49] : memref<8x1xf32, #tpu.memory_space<vmem>>, vector<8x1xf32>
    %56 = vector.broadcast %55 : vector<8x1xf32> to vector<8x288xf32>
    %57 = arith.addf %54, %56 : vector<8x288xf32>
    %c0_50 = arith.constant 0 : index
    %c0_51 = arith.constant 0 : index
    %58 = vector.load %arg7[%c0_50, %c0_51] : memref<1x288xf32, #tpu.memory_space<vmem>>, vector<1x288xf32>
    %59 = vector.broadcast %58 : vector<1x288xf32> to vector<8x288xf32>
    %60 = arith.mulf %57, %59 : vector<8x288xf32>
    %cst_52 = arith.constant dense<0.000000e+00> : vector<8xf32>
    %61 = vector.multi_reduction <add>, %60, %cst_52 [1] : vector<8x288xf32> to vector<8xf32>
    %62 = vector.shape_cast %61 : vector<8xf32> to vector<8x1xf32>
    %cst_53 = arith.constant 3.906250e-03 : f32
    %63 = vector.broadcast %cst_53 : f32 to vector<8x1xf32>
    %64 = arith.mulf %62, %63 : vector<8x1xf32>
    %65 = vector.broadcast %64 : vector<8x1xf32> to vector<8x288xf32>
    %66 = arith.subf %57, %65 : vector<8x288xf32>
    %67 = vector.broadcast %58 : vector<1x288xf32> to vector<8x288xf32>
    %68 = arith.mulf %66, %67 : vector<8x288xf32>
    %69 = arith.mulf %68, %68 : vector<8x288xf32>
    %cst_54 = arith.constant dense<0.000000e+00> : vector<8xf32>
    %70 = vector.multi_reduction <add>, %69, %cst_54 [1] : vector<8x288xf32> to vector<8xf32>
    %71 = vector.shape_cast %70 : vector<8xf32> to vector<8x1xf32>
    %cst_55 = arith.constant 3.906250e-03 : f32
    %72 = vector.broadcast %cst_55 : f32 to vector<8x1xf32>
    %73 = arith.mulf %71, %72 : vector<8x1xf32>
    %74 = vector.broadcast %64 : vector<8x1xf32> to vector<8x288xf32>
    %75 = arith.subf %57, %74 : vector<8x288xf32>
    %cst_56 = arith.constant 9.99999974E-6 : f32
    %76 = vector.broadcast %cst_56 : f32 to vector<8x1xf32>
    %77 = arith.addf %73, %76 : vector<8x1xf32>
    %78 = math.rsqrt %77 : vector<8x1xf32>
    %79 = vector.broadcast %78 : vector<8x1xf32> to vector<8x288xf32>
    %80 = arith.mulf %75, %79 : vector<8x288xf32>
    %c0_57 = arith.constant 0 : index
    %c0_58 = arith.constant 0 : index
    %81 = vector.load %arg5[%c0_57, %c0_58] : memref<8x1xf32, #tpu.memory_space<vmem>>, vector<8x1xf32>
    %82 = vector.broadcast %81 : vector<8x1xf32> to vector<8x288xf32>
    %83 = arith.mulf %80, %82 : vector<8x288xf32>
    %c0_59 = arith.constant 0 : index
    %c0_60 = arith.constant 0 : index
    %84 = vector.load %arg6[%c0_59, %c0_60] : memref<8x1xf32, #tpu.memory_space<vmem>>, vector<8x1xf32>
    %85 = vector.broadcast %84 : vector<8x1xf32> to vector<8x288xf32>
    %86 = arith.addf %83, %85 : vector<8x288xf32>
    %cst_61 = arith.constant 0.000000e+00 : f32
    %87 = vector.broadcast %cst_61 : f32 to vector<8x288xf32>
    %88 = arith.maximumf %86, %87 : vector<8x288xf32>
    %89 = vector.broadcast %58 : vector<1x288xf32> to vector<8x288xf32>
    %90 = arith.mulf %88, %89 : vector<8x288xf32>
    %91 = arith.truncf %90 : vector<8x288xf32> to vector<8x288xbf16>
    %c0_62 = arith.constant 0 : index
    %c0_63 = arith.constant 0 : index
    %c0_64 = arith.constant 0 : index
    %92 = vector.load %arg8[%c0_62, %c0_63, %c0_64] : memref<1x8x288xbf16, #tpu.memory_space<vmem>>, vector<1x8x288xbf16>
    %93 = vector.shape_cast %92 : vector<1x8x288xbf16> to vector<8x288xbf16>
    %94 = vector.shape_cast %91 : vector<8x288xbf16> to vector<1x8x288xbf16>
    tpu.vector_store %arg8[%c0_62, %c0_63, %c0_64], %94 {strides = array<i32>} : memref<1x8x288xbf16, #tpu.memory_space<vmem>>, vector<1x8x288xbf16>,
    return
  }
  func.func @transform_0(%arg0: i32, %arg1: i32) -> (i32, i32, i32) {
    %c0_i32 = arith.constant 0 : i32
    %c0_i32_0 = arith.constant 0 : i32
    %c0_i32_1 = arith.constant 0 : i32
    return %arg0, %c0_i32, %c0_i32_0 : i32, i32, i32
  }
  func.func @transform_1(%arg0: i32, %arg1: i32) -> (i32, i32, i32) {
    %c0_i32 = arith.constant 0 : i32
    %c0_i32_0 = arith.constant 0 : i32
    %c0_i32_1 = arith.constant 0 : i32
    return %c0_i32, %arg1, %c0_i32_0 : i32, i32, i32
  }
  func.func @transform_2(%arg0: i32, %arg1: i32) -> (i32, i32) {
    %c0_i32 = arith.constant 0 : i32
    %c0_i32_0 = arith.constant 0 : i32
    return %arg1, %c0_i32 : i32, i32
  }
  func.func @transform_3(%arg0: i32, %arg1: i32) -> (i32, i32) {
    %c0_i32 = arith.constant 0 : i32
    %c0_i32_0 = arith.constant 0 : i32
    return %arg1, %c0_i32 : i32, i32
  }
  func.func @transform_4(%arg0: i32, %arg1: i32) -> (i32, i32) {
    %c0_i32 = arith.constant 0 : i32
    %c0_i32_0 = arith.constant 0 : i32
    return %arg1, %c0_i32 : i32, i32
  }
  func.func @transform_5(%arg0: i32, %arg1: i32) -> (i32, i32) {
    %c0_i32 = arith.constant 0 : i32
    %c0_i32_0 = arith.constant 0 : i32
    %c0_i32_1 = arith.constant 0 : i32
    return %c0_i32, %c0_i32_0 : i32, i32
  }
  func.func @transform_6(%arg0: i32, %arg1: i32) -> (i32, i32, i32) {
    %c0_i32 = arith.constant 0 : i32
    %c0_i32_0 = arith.constant 0 : i32
    return %arg0, %arg1, %c0_i32 : i32, i32, i32
  }
}

module attributes {stable_mosaic.version = 11 : i64} {
  func.func @_conv_in_act_kernel(%arg0: i32, %arg1: i32, %arg2: memref<1x8x342xbf16, #tpu.memory_space<vmem>>, %arg3: memref<9x8x8xbf16, #tpu.memory_space<vmem>>, %arg4: memref<8x1xf32, #tpu.memory_space<vmem>>, %arg5: memref<8x1xf32, #tpu.memory_space<vmem>>, %arg6: memref<8x1xf32, #tpu.memory_space<vmem>>, %arg7: memref<1x288xf32, #tpu.memory_space<vmem>>, %arg8: memref<1x8x288xf32, #tpu.memory_space<vmem>>) attributes {dimension_semantics = [#tpu.dimension_semantics<parallel>, #tpu.dimension_semantics<parallel>], iteration_bounds = array<i64: 2, 1>, scalar_prefetch = 0 : i64, scratch_operands = 0 : i64, tpu.core_type = #tpu.core_type<tc>, window_params = [{transform_indices = @transform_0, window_bounds = array<i64: 1, 8, 342>}, {transform_indices = @transform_1, window_bounds = array<i64: 9, 8, 8>}, {transform_indices = @transform_2, window_bounds = array<i64: 8, 1>}, {transform_indices = @transform_3, window_bounds = array<i64: 8, 1>}, {transform_indices = @transform_4, window_bounds = array<i64: 8, 1>}, {pipeline_mode = #tpu.pipeline_mode<synchronous>, transform_indices = @transform_5, window_bounds = array<i64: 1, 288>}, {transform_indices = @transform_6, window_bounds = array<i64: 1, 8, 288>}]} {
    %cst = arith.constant 0.000000e+00 : f32
    %0 = vector.broadcast %cst : f32 to vector<8x288xf32>
    %c0 = arith.constant 0 : index
    %c0_0 = arith.constant 0 : index
    %c0_1 = arith.constant 0 : index
    %1 = vector.load %arg2[%c0, %c0_0, %c0_1] : memref<1x8x342xbf16, #tpu.memory_space<vmem>>, vector<1x8x288xbf16>
    %2 = vector.shape_cast %1 : vector<1x8x288xbf16> to vector<8x288xbf16>
    %c0_2 = arith.constant 0 : index
    %c0_3 = arith.constant 0 : index
    %c0_4 = arith.constant 0 : index
    %3 = vector.load %arg3[%c0_2, %c0_3, %c0_4] : memref<9x8x8xbf16, #tpu.memory_space<vmem>>, vector<1x8x8xbf16>
    %4 = vector.shape_cast %3 : vector<1x8x8xbf16> to vector<8x8xbf16>
    %cst_5 = arith.constant dense<0.000000e+00> : vector<8x288xf32>
    %5 = tpu.matmul %4, %2, %cst_5 {dimension_numbers = #tpu.dot_dimension_numbers<[1], [0], [0], [1], [0, 0, 1, 1], [], []>} : vector<8x8xbf16>, vector<8x288xbf16>, vector<8x288xf32> -> vector<8x288xf32>
    %6 = arith.addf %0, %5 : vector<8x288xf32>
    %c0_6 = arith.constant 0 : index
    %c0_7 = arith.constant 0 : index
    %c1 = arith.constant 1 : index
    %7 = vector.load %arg2[%c0_6, %c0_7, %c1] : memref<1x8x342xbf16, #tpu.memory_space<vmem>>, vector<1x8x288xbf16>
    %8 = vector.shape_cast %7 : vector<1x8x288xbf16> to vector<8x288xbf16>
    %c1_8 = arith.constant 1 : index
    %c0_9 = arith.constant 0 : index
    %c0_10 = arith.constant 0 : index
    %9 = vector.load %arg3[%c1_8, %c0_9, %c0_10] : memref<9x8x8xbf16, #tpu.memory_space<vmem>>, vector<1x8x8xbf16>
    %10 = vector.shape_cast %9 : vector<1x8x8xbf16> to vector<8x8xbf16>
    %cst_11 = arith.constant dense<0.000000e+00> : vector<8x288xf32>
    %11 = tpu.matmul %10, %8, %cst_11 {dimension_numbers = #tpu.dot_dimension_numbers<[1], [0], [0], [1], [0, 0, 1, 1], [], []>} : vector<8x8xbf16>, vector<8x288xbf16>, vector<8x288xf32> -> vector<8x288xf32>
    %12 = arith.addf %6, %11 : vector<8x288xf32>
    %c0_12 = arith.constant 0 : index
    %c0_13 = arith.constant 0 : index
    %c2 = arith.constant 2 : index
    %13 = vector.load %arg2[%c0_12, %c0_13, %c2] : memref<1x8x342xbf16, #tpu.memory_space<vmem>>, vector<1x8x288xbf16>
    %14 = vector.shape_cast %13 : vector<1x8x288xbf16> to vector<8x288xbf16>
    %c2_14 = arith.constant 2 : index
    %c0_15 = arith.constant 0 : index
    %c0_16 = arith.constant 0 : index
    %15 = vector.load %arg3[%c2_14, %c0_15, %c0_16] : memref<9x8x8xbf16, #tpu.memory_space<vmem>>, vector<1x8x8xbf16>
    %16 = vector.shape_cast %15 : vector<1x8x8xbf16> to vector<8x8xbf16>
    %cst_17 = arith.constant dense<0.000000e+00> : vector<8x288xf32>
    %17 = tpu.matmul %16, %14, %cst_17 {dimension_numbers = #tpu.dot_dimension_numbers<[1], [0], [0], [1], [0, 0, 1, 1], [], []>} : vector<8x8xbf16>, vector<8x288xbf16>, vector<8x288xf32> -> vector<8x288xf32>
    %18 = arith.addf %12, %17 : vector<8x288xf32>
    %c0_18 = arith.constant 0 : index
    %c0_19 = arith.constant 0 : index
    %c18 = arith.constant 18 : index
    %19 = vector.load %arg2[%c0_18, %c0_19, %c18] : memref<1x8x342xbf16, #tpu.memory_space<vmem>>, vector<1x8x288xbf16>
    %20 = vector.shape_cast %19 : vector<1x8x288xbf16> to vector<8x288xbf16>
    %c3 = arith.constant 3 : index
    %c0_20 = arith.constant 0 : index
    %c0_21 = arith.constant 0 : index
    %21 = vector.load %arg3[%c3, %c0_20, %c0_21] : memref<9x8x8xbf16, #tpu.memory_space<vmem>>, vector<1x8x8xbf16>
    %22 = vector.shape_cast %21 : vector<1x8x8xbf16> to vector<8x8xbf16>
    %cst_22 = arith.constant dense<0.000000e+00> : vector<8x288xf32>
    %23 = tpu.matmul %22, %20, %cst_22 {dimension_numbers = #tpu.dot_dimension_numbers<[1], [0], [0], [1], [0, 0, 1, 1], [], []>} : vector<8x8xbf16>, vector<8x288xbf16>, vector<8x288xf32> -> vector<8x288xf32>
    %24 = arith.addf %18, %23 : vector<8x288xf32>
    %c0_23 = arith.constant 0 : index
    %c0_24 = arith.constant 0 : index
    %c19 = arith.constant 19 : index
    %25 = vector.load %arg2[%c0_23, %c0_24, %c19] : memref<1x8x342xbf16, #tpu.memory_space<vmem>>, vector<1x8x288xbf16>
    %26 = vector.shape_cast %25 : vector<1x8x288xbf16> to vector<8x288xbf16>
    %c4 = arith.constant 4 : index
    %c0_25 = arith.constant 0 : index
    %c0_26 = arith.constant 0 : index
    %27 = vector.load %arg3[%c4, %c0_25, %c0_26] : memref<9x8x8xbf16, #tpu.memory_space<vmem>>, vector<1x8x8xbf16>
    %28 = vector.shape_cast %27 : vector<1x8x8xbf16> to vector<8x8xbf16>
    %cst_27 = arith.constant dense<0.000000e+00> : vector<8x288xf32>
    %29 = tpu.matmul %28, %26, %cst_27 {dimension_numbers = #tpu.dot_dimension_numbers<[1], [0], [0], [1], [0, 0, 1, 1], [], []>} : vector<8x8xbf16>, vector<8x288xbf16>, vector<8x288xf32> -> vector<8x288xf32>
    %30 = arith.addf %24, %29 : vector<8x288xf32>
    %c0_28 = arith.constant 0 : index
    %c0_29 = arith.constant 0 : index
    %c20 = arith.constant 20 : index
    %31 = vector.load %arg2[%c0_28, %c0_29, %c20] : memref<1x8x342xbf16, #tpu.memory_space<vmem>>, vector<1x8x288xbf16>
    %32 = vector.shape_cast %31 : vector<1x8x288xbf16> to vector<8x288xbf16>
    %c5 = arith.constant 5 : index
    %c0_30 = arith.constant 0 : index
    %c0_31 = arith.constant 0 : index
    %33 = vector.load %arg3[%c5, %c0_30, %c0_31] : memref<9x8x8xbf16, #tpu.memory_space<vmem>>, vector<1x8x8xbf16>
    %34 = vector.shape_cast %33 : vector<1x8x8xbf16> to vector<8x8xbf16>
    %cst_32 = arith.constant dense<0.000000e+00> : vector<8x288xf32>
    %35 = tpu.matmul %34, %32, %cst_32 {dimension_numbers = #tpu.dot_dimension_numbers<[1], [0], [0], [1], [0, 0, 1, 1], [], []>} : vector<8x8xbf16>, vector<8x288xbf16>, vector<8x288xf32> -> vector<8x288xf32>
    %36 = arith.addf %30, %35 : vector<8x288xf32>
    %c0_33 = arith.constant 0 : index
    %c0_34 = arith.constant 0 : index
    %c36 = arith.constant 36 : index
    %37 = vector.load %arg2[%c0_33, %c0_34, %c36] : memref<1x8x342xbf16, #tpu.memory_space<vmem>>, vector<1x8x288xbf16>
    %38 = vector.shape_cast %37 : vector<1x8x288xbf16> to vector<8x288xbf16>
    %c6 = arith.constant 6 : index
    %c0_35 = arith.constant 0 : index
    %c0_36 = arith.constant 0 : index
    %39 = vector.load %arg3[%c6, %c0_35, %c0_36] : memref<9x8x8xbf16, #tpu.memory_space<vmem>>, vector<1x8x8xbf16>
    %40 = vector.shape_cast %39 : vector<1x8x8xbf16> to vector<8x8xbf16>
    %cst_37 = arith.constant dense<0.000000e+00> : vector<8x288xf32>
    %41 = tpu.matmul %40, %38, %cst_37 {dimension_numbers = #tpu.dot_dimension_numbers<[1], [0], [0], [1], [0, 0, 1, 1], [], []>} : vector<8x8xbf16>, vector<8x288xbf16>, vector<8x288xf32> -> vector<8x288xf32>
    %42 = arith.addf %36, %41 : vector<8x288xf32>
    %c0_38 = arith.constant 0 : index
    %c0_39 = arith.constant 0 : index
    %c37 = arith.constant 37 : index
    %43 = vector.load %arg2[%c0_38, %c0_39, %c37] : memref<1x8x342xbf16, #tpu.memory_space<vmem>>, vector<1x8x288xbf16>
    %44 = vector.shape_cast %43 : vector<1x8x288xbf16> to vector<8x288xbf16>
    %c7 = arith.constant 7 : index
    %c0_40 = arith.constant 0 : index
    %c0_41 = arith.constant 0 : index
    %45 = vector.load %arg3[%c7, %c0_40, %c0_41] : memref<9x8x8xbf16, #tpu.memory_space<vmem>>, vector<1x8x8xbf16>
    %46 = vector.shape_cast %45 : vector<1x8x8xbf16> to vector<8x8xbf16>
    %cst_42 = arith.constant dense<0.000000e+00> : vector<8x288xf32>
    %47 = tpu.matmul %46, %44, %cst_42 {dimension_numbers = #tpu.dot_dimension_numbers<[1], [0], [0], [1], [0, 0, 1, 1], [], []>} : vector<8x8xbf16>, vector<8x288xbf16>, vector<8x288xf32> -> vector<8x288xf32>
    %48 = arith.addf %42, %47 : vector<8x288xf32>
    %c0_43 = arith.constant 0 : index
    %c0_44 = arith.constant 0 : index
    %c38 = arith.constant 38 : index
    %49 = vector.load %arg2[%c0_43, %c0_44, %c38] : memref<1x8x342xbf16, #tpu.memory_space<vmem>>, vector<1x8x288xbf16>
    %50 = vector.shape_cast %49 : vector<1x8x288xbf16> to vector<8x288xbf16>
    %c8 = arith.constant 8 : index
    %c0_45 = arith.constant 0 : index
    %c0_46 = arith.constant 0 : index
    %51 = vector.load %arg3[%c8, %c0_45, %c0_46] : memref<9x8x8xbf16, #tpu.memory_space<vmem>>, vector<1x8x8xbf16>
    %52 = vector.shape_cast %51 : vector<1x8x8xbf16> to vector<8x8xbf16>
    %cst_47 = arith.constant dense<0.000000e+00> : vector<8x288xf32>
    %53 = tpu.matmul %52, %50, %cst_47 {dimension_numbers = #tpu.dot_dimension_numbers<[1], [0], [0], [1], [0, 0, 1, 1], [], []>} : vector<8x8xbf16>, vector<8x288xbf16>, vector<8x288xf32> -> vector<8x288xf32>
    %54 = arith.addf %48, %53 : vector<8x288xf32>
    %c0_48 = arith.constant 0 : index
    %c0_49 = arith.constant 0 : index
    %55 = vector.load %arg4[%c0_48, %c0_49] : memref<8x1xf32, #tpu.memory_space<vmem>>, vector<8x1xf32>
    %56 = vector.broadcast %55 : vector<8x1xf32> to vector<8x288xf32>
    %57 = arith.addf %54, %56 : vector<8x288xf32>
    %c0_50 = arith.constant 0 : index
    %c0_51 = arith.constant 0 : index
    %58 = vector.load %arg7[%c0_50, %c0_51] : memref<1x288xf32, #tpu.memory_space<vmem>>, vector<1x288xf32>
    %59 = vector.broadcast %58 : vector<1x288xf32> to vector<8x288xf32>
    %60 = arith.mulf %57, %59 : vector<8x288xf32>
    %cst_52 = arith.constant dense<0.000000e+00> : vector<8xf32>
    %61 = vector.multi_reduction <add>, %60, %cst_52 [1] : vector<8x288xf32> to vector<8xf32>
    %62 = vector.shape_cast %61 : vector<8xf32> to vector<8x1xf32>
    %cst_53 = arith.constant 3.906250e-03 : f32
    %63 = vector.broadcast %cst_53 : f32 to vector<8x1xf32>
    %64 = arith.mulf %62, %63 : vector<8x1xf32>
    %65 = vector.broadcast %64 : vector<8x1xf32> to vector<8x288xf32>
    %66 = arith.subf %57, %65 : vector<8x288xf32>
    %67 = vector.broadcast %58 : vector<1x288xf32> to vector<8x288xf32>
    %68 = arith.mulf %66, %67 : vector<8x288xf32>
    %69 = arith.mulf %68, %68 : vector<8x288xf32>
    %cst_54 = arith.constant dense<0.000000e+00> : vector<8xf32>
    %70 = vector.multi_reduction <add>, %69, %cst_54 [1] : vector<8x288xf32> to vector<8xf32>
    %71 = vector.shape_cast %70 : vector<8xf32> to vector<8x1xf32>
    %cst_55 = arith.constant 3.906250e-03 : f32
    %72 = vector.broadcast %cst_55 : f32 to vector<8x1xf32>
    %73 = arith.mulf %71, %72 : vector<8x1xf32>
    %74 = vector.broadcast %64 : vector<8x1xf32> to vector<8x288xf32>
    %75 = arith.subf %57, %74 : vector<8x288xf32>
    %cst_56 = arith.constant 9.99999974E-6 : f32
    %76 = vector.broadcast %cst_56 : f32 to vector<8x1xf32>
    %77 = arith.addf %73, %76 : vector<8x1xf32>
    %78 = math.rsqrt %77 : vector<8x1xf32>
    %79 = vector.broadcast %78 : vector<8x1xf32> to vector<8x288xf32>
    %80 = arith.mulf %75, %79 : vector<8x288xf32>
    %c0_57 = arith.constant 0 : index
    %c0_58 = arith.constant 0 : index
    %81 = vector.load %arg5[%c0_57, %c0_58] : memref<8x1xf32, #tpu.memory_space<vmem>>, vector<8x1xf32>
    %82 = vector.broadcast %81 : vector<8x1xf32> to vector<8x288xf32>
    %83 = arith.mulf %80, %82 : vector<8x288xf32>
    %c0_59 = arith.constant 0 : index
    %c0_60 = arith.constant 0 : index
    %84 = vector.load %arg6[%c0_59, %c0_60] : memref<8x1xf32, #tpu.memory_space<vmem>>, vector<8x1xf32>
    %85 = vector.broadcast %84 : vector<8x1xf32> to vector<8x288xf32>
    %86 = arith.addf %83, %85 : vector<8x288xf32>
    %87 = vector.broadcast %58 : vector<1x288xf32> to vector<8x288xf32>
    %88 = arith.mulf %86, %87 : vector<8x288xf32>
    %c0_61 = arith.constant 0 : index
    %c0_62 = arith.constant 0 : index
    %c0_63 = arith.constant 0 : index
    %89 = vector.load %arg8[%c0_61, %c0_62, %c0_63] : memref<1x8x288xf32, #tpu.memory_space<vmem>>, vector<1x8x288xf32>
    %90 = vector.shape_cast %89 : vector<1x8x288xf32> to vector<8x288xf32>
    %91 = vector.shape_cast %88 : vector<8x288xf32> to vector<1x8x288xf32>
    tpu.vector_store %arg8[%c0_61, %c0_62, %c0_63], %91 {strides = array<i32>} : memref<1x8x288xf32, #tpu.memory_space<vmem>>, vector<1x8x288xf32>,
    return
  }
  func.func @transform_0(%arg0: i32, %arg1: i32) -> (i32, i32, i32) {
    %c0_i32 = arith.constant 0 : i32
    %c0_i32_0 = arith.constant 0 : i32
    %c0_i32_1 = arith.constant 0 : i32
    return %arg0, %c0_i32, %c0_i32_0 : i32, i32, i32
  }
  func.func @transform_1(%arg0: i32, %arg1: i32) -> (i32, i32, i32) {
    %c0_i32 = arith.constant 0 : i32
    %c0_i32_0 = arith.constant 0 : i32
    %c0_i32_1 = arith.constant 0 : i32
    return %c0_i32, %arg1, %c0_i32_0 : i32, i32, i32
  }
  func.func @transform_2(%arg0: i32, %arg1: i32) -> (i32, i32) {
    %c0_i32 = arith.constant 0 : i32
    %c0_i32_0 = arith.constant 0 : i32
    return %arg1, %c0_i32 : i32, i32
  }
  func.func @transform_3(%arg0: i32, %arg1: i32) -> (i32, i32) {
    %c0_i32 = arith.constant 0 : i32
    %c0_i32_0 = arith.constant 0 : i32
    return %arg1, %c0_i32 : i32, i32
  }
  func.func @transform_4(%arg0: i32, %arg1: i32) -> (i32, i32) {
    %c0_i32 = arith.constant 0 : i32
    %c0_i32_0 = arith.constant 0 : i32
    return %arg1, %c0_i32 : i32, i32
  }
  func.func @transform_5(%arg0: i32, %arg1: i32) -> (i32, i32) {
    %c0_i32 = arith.constant 0 : i32
    %c0_i32_0 = arith.constant 0 : i32
    %c0_i32_1 = arith.constant 0 : i32
    return %c0_i32, %c0_i32_0 : i32, i32
  }
  func.func @transform_6(%arg0: i32, %arg1: i32) -> (i32, i32, i32) {
    %c0_i32 = arith.constant 0 : i32
    %c0_i32_0 = arith.constant 0 : i32
    return %arg0, %arg1, %c0_i32 : i32, i32, i32
  }
}

</mosaic_0001>

<bundles_post_ra>
// kernel: resblock_forward.3
= control target key start
LH: loop header
LB: loop body
LE: loop exit
PB: predicated region body
PF: predicated region fallthrough
CT: control target
= control target key end

     0   :  { %s1763_s21 = smov 0   ;;  %s1765_s22 = smov 0   ;;  %s1927_s0 = inlined_call_operand.vmem [shape: bf16[2,8,342], index: 0, kind: input, shape index: {}]   ;;  %s1928_s1 = inlined_call_operand.vmem [shape: bf16[9,8,8], index: 1, kind: input, shape index: {}]   ;;  %s1929_s2 = inlined_call_operand.vmem [shape: f32[8,1], index: 2, kind: input, shape index: {}]   ;;  %s1930_s3 = inlined_call_operand.vmem [shape: f32[8,1], index: 3, kind: input, shape index: {}]   ;;  %s1931_s4 = inlined_call_operand.vmem [shape: f32[8,1], index: 4, kind: input, shape index: {}]   ;;  %s1932_s5 = inlined_call_operand.vmem [shape: f32[1,288], index: 5, kind: input, shape index: {}]   ;;  %s1933_s6 = inlined_call_operand.vmem [shape: f32[2,8,288], index: 6, kind: output, shape index: {}]  }
   0x1   :  { %s1767_s23 = smov 0  }
   0x2 LB: > { %s28_s24 = sadd.s32 1, %s1711_s22  ;;  %p1534_p0 = scmp.ge.s32.totalorder %s1715_s23, 1  ;;  %s1715_s23 = sphi %s1767_s23, %s16_s23   ;;  %s1711_s22 = sphi %s1765_s22, %s1935_s22   ;;  %s1707_s21 = sphi %s1763_s21, %s1934_s21  }
   0x3   : > { %p30_p1 = scmp.ge.s32.totalorder %s28_s24, 2  ;;  %p262_p2 = scmp.lt.s32.totalorder %s1715_s23, 3 }
   0x5   : > { %s1937_s24 = smov (%p30_p1, %s28_s24), 0  ;;  %p263_p3 = pnand %p1534_p0, %p262_p2 }
   0x6   : > { %p312_p4 = scmp.lt.s32.totalorder (!%p263_p3), %s1707_s21, 1  ;;  %v1717_v0 = vmov (!%p263_p3), 0.0   ;;  %vm1718_vm0 = vmmov (!%p263_p3), 0   ;;  %v1719_v1 = vmov (!%p263_p3), 0   ;;  %s1720_s29 = smov (!%p263_p3), 127   ;;  %v1302_v6 = vld [vmem:[%s1929_s2] sm:$0xff] (!%p263_p3) }
   0x7   : > { %266 = sbr.rel (%p263_p3) target bundleno = 753 (0x2f1), region = 44  ;;  %1595 = vmatprep.subr.bf16.mxu1 (!%p263_p3), %v1717_v0  ;;  %1597 = vmatprep.mubr.msk.bf16.mxu1 (!%p263_p3), %vm1718_vm0, %v1717_v0  ;;  %s1721_s30 = smov (!%p263_p3), 126   ;;  %vm369_vm1 = vcmask (!%p263_p3), 1043456   ;;  %v1537_v10 = vld [vmem:[%s1928_s1 + $0x4] sm:$0xf] (!%p263_p3)  ;;  %vm365_vm2 = vcmask (!%p263_p3), 64512  }
   0x8   : > { %411 = vmatprep.mubr.bf16.mxu0 (!%p263_p3), %v1719_v1  ;;  %1686 = vset.pattern.permute.xlu0 (!%p263_p3), %v1719_v1  ;;  %s1722_s7 = smov (!%p263_p3), 110   ;;  %s1723_s8 = smov (!%p263_p3), 109   ;;  %vm362_vm3 = vcmask (!%p263_p3), 1039360   ;;  %vm561_vm4 = vcmask (!%p263_p3), 1031168   ;;  %v345_v20 = vld [vmem:[%s1928_s1] sm:$0xf] (!%p263_p3) }
   0x9   : > { %1687 = vset.pattern.permute.xlu1 (!%p263_p3), %v1719_v1  ;;  %s1724_s9 = smov (!%p263_p3), 108   ;;  %s1725_s10 = smov (!%p263_p3), 92   ;;  %vm668_vm5 = vcmask (!%p263_p3), 900096   ;;  %v1547_v29 = vld [vmem:[%s1928_s1 + $0x8] sm:$0xf] (!%p263_p3)  ;;  %vm775_vm6 = vcmask (!%p263_p3), 891904  }
   0xa   : > { %s1726_s11 = smov (!%p263_p3), 91   ;;  %s1727_s12 = smov (!%p263_p3), 90   ;;  %v1551_v37 = vld [vmem:[%s1928_s1 + $0xc] sm:$0xf] (!%p263_p3)  ;;  %vm882_vm7 = vcmask (!%p263_p3), 883712   ;;  %vm989_vm8 = vcmask (!%p263_p3), 752640  }
   0xb   : > { %v1555_v45 = vld [vmem:[%s1928_s1 + $0x10] sm:$0xf] (!%p263_p3)  ;;  %v1559_v53 = vld [vmem:[%s1928_s1 + $0x14] sm:$0xf] (!%p263_p3)  ;;  %vm1096_vm9 = vcmask (!%p263_p3), 744448   ;;  %vm1203_vm10 = vcmask (!%p263_p3), 736256  }
   0xc   : > { %v1563_v61 = vld [vmem:[%s1928_s1 + $0x18] sm:$0xf] (!%p263_p3)  ;;  %vm1332_vm11 = vcmask (!%p263_p3), 261120  }
   0xe   : > { %s1939_s21 = smov (!%p312_p4, %s1707_s21), 1 }
   0xf   : > { %s1649_s25 = smul.u32 12, %s1939_s21 }
  0x10   : > { %s1650_s19 = smul.u32 24, %s1939_s21 }
  0x11   : > { %s316_s28 = scalar_lea.vmem %s1927_s0, %s1649_s25 }
  0x12   : > { %v1688_v2 = vld [vmem:[%s316_s28 + $0x8] ss:$0 sps:$4 sm:$0xff]   ;;  %v343_v3 = vld [vmem:[%s316_s28] sm:$0xff]  ;;  %s341_s26 = scalar_lea.vmem %s1933_s6, %s1650_s19 }
  0x13   : > { %v1538_v4 = vcombine.low %v343_v3, %v343_v3  ;;  %360 = vrot.lane.b32.xlu1 %v1688_v2, %s1720_s29  ;;  %v1539_v5 = vcombine.high %v343_v3, %v343_v3  ;;  %v470_v11 = vsel %vm369_vm1, %v1688_v2, 0 }
  0x15   : > { %356 = vrot.lane.b32.xlu0 %v1538_v4, %s1720_s29  ;;  %v464_v18 = vsel %vm369_vm1, %v1538_v4, 0 }
  0x17   : > { %555 = vrot.lane.b32.xlu1 %v1538_v4, %s1721_s30 }
  0x19   : > { %358 = vrot.lane.b32.xlu0 %v1539_v5, %s1720_s29 }
  0x1b   : > { %559 = vrot.lane.b32.xlu1 %v1688_v2, %s1721_s30 }
  0x1d   : > { %557 = vrot.lane.b32.xlu0 %v1539_v5, %s1721_s30 }
  0x1f   : > { %664 = vrot.lane.b32.xlu1 %v1539_v5, %s1722_s7 }
  0x21   : > { %662 = vrot.lane.b32.xlu0 %v1538_v4, %s1722_s7 }
  0x23   : > { %769 = vrot.lane.b32.xlu1 %v1538_v4, %s1723_s8 }
  0x25   : > { %666 = vrot.lane.b32.xlu0 %v1688_v2, %s1722_s7 }
  0x27   : > { %773 = vrot.lane.b32.xlu1 %v1688_v2, %s1723_s8 }
  0x29   : > { %771 = vrot.lane.b32.xlu0 %v1539_v5, %s1723_s8 }
  0x2b   : > { %878 = vrot.lane.b32.xlu1 %v1539_v5, %s1724_s9 }
  0x2d   : > { %876 = vrot.lane.b32.xlu0 %v1538_v4, %s1724_s9 }
  0x2f   : > { %983 = vrot.lane.b32.xlu1 %v1538_v4, %s1725_s10 }
  0x31   : > { %880 = vrot.lane.b32.xlu0 %v1688_v2, %s1724_s9 }
  0x33   : > { %987 = vrot.lane.b32.xlu1 %v1688_v2, %s1725_s10 }
  0x35   : > { %985 = vrot.lane.b32.xlu0 %v1539_v5, %s1725_s10 }
  0x37   : > { %1092 = vrot.lane.b32.xlu1 %v1539_v5, %s1726_s11 }
  0x39   : > { %1090 = vrot.lane.b32.xlu0 %v1538_v4, %s1726_s11 }
  0x3b   : > { %1197 = vrot.lane.b32.xlu1 %v1538_v4, %s1727_s12 }
  0x3d   : > { %1094 = vrot.lane.b32.xlu0 %v1688_v2, %s1726_s11 }
  0x3f   : > { %1201 = vrot.lane.b32.xlu1 %v1688_v2, %s1727_s12 }
  0x41   : > { %1199 = vrot.lane.b32.xlu0 %v1539_v5, %s1727_s12 }
  0x45   : > { %1305 = vperm.xlu0 %1686, %v1302_v6   ;;  %v1567_v6 = vld [vmem:[%s1928_s1 + $0x1c] sm:$0xf] }
  0x85   : > { %v361_v7 = vpop.permute.xlu1 %360 }
  0x86   : > { %v377_v9 = vsel %vm369_vm1, %v361_v7, 0 }
  0x87   : > { %v357_v8 = vpop.permute.xlu0 %356  ;;  %1596 = vmatpush3.bf16.msra.mxu1 %v377_v9 }
  0x88   : > { %1601 = vmatprep.subr.bf16.mxu1 %v1717_v0 }
  0x89   : > { %v556_v12 = vpop.permute.xlu1 %555 }
  0x8a   : > { %1598 = vmatmul.mubr.msk.bf16.vlgmr.msra.gmra.mrb[0].mxu1 %vm365_vm2, %v1537_v10 }
  0x8b   : > { %v359_v13 = vpop.permute.xlu0 %358  ;;  %1602 = vmatpush3.bf16.msra.mxu1 %v470_v11  ;;  %1603 = vmatprep.mubr.msk.bf16.mxu1 %vm1718_vm0, %v1717_v0  ;;  %v1571_v11 = vld [vmem:[%s1928_s1 + $0x20] sm:$0xf] }
  0x8c   : > { %v364_v14 = vsel %vm362_vm3, %v359_v13, %v361_v7  ;;  %v363_v15 = vsel %vm362_vm3, %v357_v8, %v359_v13  ;;  %1607 = vmatprep.subr.bf16.mxu1 %v1717_v0 }
  0x8d   : > { %1541 = vmatprep.subr.msk.bf16.mxu0 %vm369_vm1, %v364_v14  ;;  %v371_v16 = vsel %vm369_vm1, %v363_v15, 0  ;;  %v560_v17 = vpop.permute.xlu1 %559 }
  0x8e   : > { %380 = vmatpush1.bf16.msra.mxu0 %v371_v16  ;;  %v574_v22 = vsel %vm369_vm1, %v560_v17, 0 }
  0x8f   : > { %1544 = vmatprep.subr.msk.bf16.mxu0 %vm369_vm1, %v1539_v5  ;;  %v558_v19 = vpop.permute.xlu0 %557 }
  0x90   : > { %v563_v21 = vsel %vm561_vm4, %v558_v19, %v560_v17  ;;  %v562_v25 = vsel %vm561_vm4, %v556_v12, %v558_v19 }
  0x91   : > { %1542 = vmatmul.mubr.msk.bf16.vlgmr.msra.gmra.mrb[0].mxu0 %vm365_vm2, %v1537_v10  ;;  %v665_v23 = vpop.permute.xlu1 %664  ;;  %v568_v26 = vsel %vm369_vm1, %v562_v25, 0 }
  0x92   : > { %473 = vmatpush1.bf16.msra.mxu0 %v464_v18  ;;  %504 = vmatprep.mubr.bf16.mxu0 %v1719_v1 }
  0x93   : > { %1604 = vmatmul.mubr.msk.bf16.vlgmr.msra.gmra.mrb[4].mxu1 %vm365_vm2, %v345_v20  ;;  %1548 = vmatprep.subr.msk.bf16.mxu0 %vm369_vm1, %v563_v21  ;;  %v663_v24 = vpop.permute.xlu0 %662 }
  0x94   : > { %1608 = vmatpush3.bf16.msra.mxu1 %v574_v22  ;;  %1609 = vmatprep.mubr.msk.bf16.mxu1 %vm1718_vm0, %v1717_v0  ;;  %v669_v33 = vsel %vm668_vm5, %v663_v24, %v665_v23 }
  0x95   : > { %1613 = vmatprep.subr.bf16.mxu1 %v1717_v0  ;;  %v770_v28 = vpop.permute.xlu1 %769  ;;  %v675_v35 = vsel %vm369_vm1, %v669_v33, 0 }
  0x97   : > { %v667_v27 = vpop.permute.xlu0 %666 }
  0x98   : > { %v670_v30 = vsel %vm668_vm5, %v665_v23, %v667_v27  ;;  %v681_v31 = vsel %vm369_vm1, %v667_v27, 0 }
  0x99   : > { %1545 = vmatmul.mubr.msk.bf16.vlgmr.msra.gmra.mrb[4].mxu0 %vm365_vm2, %v345_v20  ;;  %v774_v34 = vpop.permute.xlu1 %773 }
  0x9a   : > { %577 = vmatpush1.bf16.msra.mxu0 %v568_v26  ;;  %608 = vmatprep.mubr.bf16.mxu0 %v1719_v1  ;;  %v788_v39 = vsel %vm369_vm1, %v774_v34, 0 }
  0x9b   : > { %1610 = vmatmul.mubr.msk.bf16.vlgmr.msra.gmra.mrb[8].mxu1 %vm365_vm2, %v1547_v29  ;;  %1552 = vmatprep.subr.msk.bf16.mxu0 %vm369_vm1, %v670_v30  ;;  %v772_v32 = vpop.permute.xlu0 %771 }
  0x9c   : > { %1614 = vmatpush3.bf16.msra.mxu1 %v681_v31  ;;  %1615 = vmatprep.mubr.msk.bf16.mxu1 %vm1718_vm0, %v1717_v0  ;;  %v777_v38 = vsel %vm775_vm6, %v772_v32, %v774_v34  ;;  %v776_v41 = vsel %vm775_vm6, %v770_v28, %v772_v32 }
  0x9d   : > { %1619 = vmatprep.subr.bf16.mxu1 %v1717_v0  ;;  %v879_v40 = vpop.permute.xlu1 %878  ;;  %v782_v43 = vsel %vm369_vm1, %v776_v41, 0 }
  0x9f   : > { %v877_v36 = vpop.permute.xlu0 %876 }
  0xa0   : > { %v883_v49 = vsel %vm882_vm7, %v877_v36, %v879_v40 }
  0xa1   : > { %1549 = vmatmul.mubr.msk.bf16.vlgmr.msra.gmra.mrb[8].mxu0 %vm365_vm2, %v1547_v29  ;;  %v984_v44 = vpop.permute.xlu1 %983  ;;  %v889_v51 = vsel %vm369_vm1, %v883_v49, 0 }
  0xa2   : > { %684 = vmatpush1.bf16.msra.mxu0 %v675_v35  ;;  %715 = vmatprep.mubr.bf16.mxu0 %v1719_v1 }
  0xa3   : > { %1616 = vmatmul.mubr.msk.bf16.vlgmr.msra.gmra.mrb[12].mxu1 %vm365_vm2, %v1551_v37  ;;  %1556 = vmatprep.subr.msk.bf16.mxu0 %vm369_vm1, %v777_v38  ;;  %v881_v42 = vpop.permute.xlu0 %880 }
  0xa4   : > { %1620 = vmatpush3.bf16.msra.mxu1 %v788_v39  ;;  %1621 = vmatprep.mubr.msk.bf16.mxu1 %vm1718_vm0, %v1717_v0  ;;  %v884_v46 = vsel %vm882_vm7, %v879_v40, %v881_v42  ;;  %v895_v47 = vsel %vm369_vm1, %v881_v42, 0 }
  0xa5   : > { %1625 = vmatprep.subr.bf16.mxu1 %v1717_v0  ;;  %v988_v50 = vpop.permute.xlu1 %987 }
  0xa6   : > { %v1002_v55 = vsel %vm369_vm1, %v988_v50, 0 }
  0xa7   : > { %v986_v48 = vpop.permute.xlu0 %985 }
  0xa8   : > { %v991_v54 = vsel %vm989_vm8, %v986_v48, %v988_v50  ;;  %v990_v57 = vsel %vm989_vm8, %v984_v44, %v986_v48 }
  0xa9   : > { %1553 = vmatmul.mubr.msk.bf16.vlgmr.msra.gmra.mrb[12].mxu0 %vm365_vm2, %v1551_v37  ;;  %v1093_v56 = vpop.permute.xlu1 %1092  ;;  %v996_v59 = vsel %vm369_vm1, %v990_v57, 0 }
  0xaa   : > { %791 = vmatpush1.bf16.msra.mxu0 %v782_v43  ;;  %822 = vmatprep.mubr.bf16.mxu0 %v1719_v1 }
  0xab   : > { %1622 = vmatmul.mubr.msk.bf16.vlgmr.msra.gmra.mrb[16].mxu1 %vm365_vm2, %v1555_v45  ;;  %1560 = vmatprep.subr.msk.bf16.mxu0 %vm369_vm1, %v884_v46  ;;  %v1091_v52 = vpop.permute.xlu0 %1090 }
  0xac   : > { %1626 = vmatpush3.bf16.msra.mxu1 %v895_v47  ;;  %1627 = vmatprep.mubr.msk.bf16.mxu1 %vm1718_vm0, %v1717_v0  ;;  %v1097_v2 = vsel %vm1096_vm9, %v1091_v52, %v1093_v56 }
  0xad   : > { %1631 = vmatprep.subr.bf16.mxu1 %v1717_v0  ;;  %v1198_v60 = vpop.permute.xlu1 %1197  ;;  %v1103_v5 = vsel %vm369_vm1, %v1097_v2, 0 }
  0xaf   : > { %v1095_v58 = vpop.permute.xlu0 %1094 }
  0xb0   : > { %v1098_v62 = vsel %vm1096_vm9, %v1093_v56, %v1095_v58  ;;  %v1109_v63 = vsel %vm369_vm1, %v1095_v58, 0 }
  0xb1   : > { %1557 = vmatmul.mubr.msk.bf16.vlgmr.msra.gmra.mrb[16].mxu0 %vm365_vm2, %v1555_v45  ;;  %v1202_v4 = vpop.permute.xlu1 %1201 }
  0xb2   : > { %898 = vmatpush1.bf16.msra.mxu0 %v889_v51  ;;  %929 = vmatprep.mubr.bf16.mxu0 %v1719_v1  ;;  %v1216_v8 = vsel %vm369_vm1, %v1202_v4, 0 }
  0xb3   : > { %1628 = vmatmul.mubr.msk.bf16.vlgmr.msra.gmra.mrb[20].mxu1 %vm365_vm2, %v1559_v53  ;;  %1564 = vmatprep.subr.msk.bf16.mxu0 %vm369_vm1, %v991_v54  ;;  %v1200_v3 = vpop.permute.xlu0 %1199 }
  0xb4   : > { %1632 = vmatpush3.bf16.msra.mxu1 %v1002_v55  ;;  %1633 = vmatprep.mubr.msk.bf16.mxu1 %vm1718_vm0, %v1717_v0  ;;  %v1205_v7 = vsel %vm1203_vm10, %v1200_v3, %v1202_v4  ;;  %v1204_v9 = vsel %vm1203_vm10, %v1198_v60, %v1200_v3 }
  0xb5   : > { %1637 = vmatprep.subr.bf16.mxu1 %v1717_v0  ;;  %v1210_v10 = vsel %vm369_vm1, %v1204_v9, 0 }
  0xb9   : > { %1561 = vmatmul.mubr.msk.bf16.vlgmr.msra.gmra.mrb[20].mxu0 %vm365_vm2, %v1559_v53 }
  0xba   : > { %1005 = vmatpush1.bf16.msra.mxu0 %v996_v59  ;;  %1036 = vmatprep.mubr.bf16.mxu0 %v1719_v1 }
  0xbb   : > { %1634 = vmatmul.mubr.msk.bf16.vlgmr.msra.gmra.mrb[24].mxu1 %vm365_vm2, %v1563_v61  ;;  %1568 = vmatprep.subr.msk.bf16.mxu0 %vm369_vm1, %v1098_v62 }
  0xbc   : > { %1638 = vmatpush3.bf16.msra.mxu1 %v1109_v63  ;;  %1639 = vmatprep.mubr.msk.bf16.mxu1 %vm1718_vm0, %v1717_v0 }
  0xbd   : > { %1643 = vmatprep.subr.bf16.mxu1 %v1717_v0 }
  0xc1   : > { %1565 = vmatmul.mubr.msk.bf16.vlgmr.msra.gmra.mrb[24].mxu0 %vm365_vm2, %v1563_v61 }
  0xc2   : > { %1112 = vmatpush1.bf16.msra.mxu0 %v1103_v5  ;;  %1143 = vmatprep.mubr.bf16.mxu0 %v1719_v1 }
  0xc3   : > { %1640 = vmatmul.mubr.msk.bf16.vlgmr.msra.gmra.mrb[28].mxu1 %vm365_vm2, %v1567_v6  ;;  %1572 = vmatprep.subr.msk.bf16.mxu0 %vm369_vm1, %v1205_v7 }
  0xc4   : > { %1644 = vmatpush3.bf16.msra.mxu1 %v1216_v8  ;;  %1645 = vmatprep.mubr.msk.bf16.mxu1 %vm1718_vm0, %v1717_v0 }
  0xc9   : > { %1569 = vmatmul.mubr.msk.bf16.vlgmr.msra.gmra.mrb[28].mxu0 %vm365_vm2, %v1567_v6 }
  0xca   : > { %1219 = vmatpush1.bf16.msra.mxu0 %v1210_v10  ;;  %1250 = vmatprep.mubr.bf16.mxu0 %v1719_v1 }
  0xcb   : > { %1646 = vmatmul.mubr.msk.bf16.vlgmr.msra.gmra.mrb[32].mxu1 %vm365_vm2, %v1571_v11 }
  0xd1   : > { %1573 = vmatmul.mubr.msk.bf16.vlgmr.msra.gmra.mrb[32].mxu0 %vm365_vm2, %v1571_v11 }
 0x15d   : > { %v454_v12 = vpop.f32.mrb[0].mxu1 }
 0x15e   : > { %v1599_v13 = vpop.f32.mrb[1].mxu1 }
 0x15f   : > { %v457_v14 = vpop.f32.mrb[2].mxu1 }
 0x160   : > { %v1600_v15 = vpop.f32.mrb[3].mxu1 }
 0x164   : > { %v413_v0 = vpop.f32.mrb[0].mxu0 }
 0x165   : > { %v415_v16 = vpop.f32.mrb[1].mxu0 }
 0x166   : > { %v417_v17 = vpop.f32.mrb[2].mxu0  ;;  %v547_v18 = vpop.f32.mrb[4].mxu1 }
 0x167   : > { %v418_v19 = vpop.f32.mrb[3].mxu0  ;;  %v548_v20 = vadd.f32 %v547_v18, %v454_v12  ;;  %v1605_v21 = vpop.f32.mrb[5].mxu1 }
 0x168   : > { %v550_v22 = vpop.f32.mrb[6].mxu1 }
 0x169   : > { %v1606_v23 = vpop.f32.mrb[7].mxu1 }
 0x16c   : > { %v506_v24 = vpop.f32.mrb[4].mxu0 }
 0x16d   : > { %v507_v25 = vadd.f32 %v506_v24, %v413_v0  ;;  %v508_v1 = vpop.f32.mrb[5].mxu0 }
 0x16e   : > { %v509_v26 = vadd.f32 %v508_v1, %v415_v16  ;;  %v510_v27 = vpop.f32.mrb[6].mxu0  ;;  %v651_v28 = vpop.f32.mrb[8].mxu1  ;;  %v1313_v1 = vlaneseq }
 0x16f   : > { %v511_v29 = vpop.f32.mrb[7].mxu0  ;;  %v659_v30 = vadd.f32 %v651_v28, %v548_v20  ;;  %v1611_v31 = vpop.f32.mrb[9].mxu1 }
 0x170   : > { %v654_v32 = vpop.f32.mrb[10].mxu1  ;;  %v1314_v29 = vshrl.u32 %v1313_v1, 7 }
 0x171   : > { %v1612_v33 = vpop.f32.mrb[11].mxu1 }
 0x174   : > { %v610_v34 = vpop.f32.mrb[8].mxu0 }
 0x175   : > { %v657_v35 = vadd.f32 %v610_v34, %v507_v25  ;;  %v612_v36 = vpop.f32.mrb[9].mxu0 }
 0x176   : > { %v658_v37 = vadd.f32 %v612_v36, %v509_v26  ;;  %v614_v38 = vpop.f32.mrb[10].mxu0  ;;  %v758_v39 = vpop.f32.mrb[12].mxu1 }
 0x177   : > { %v615_v40 = vpop.f32.mrb[11].mxu0  ;;  %v766_v41 = vadd.f32 %v758_v39, %v659_v30  ;;  %v1617_v42 = vpop.f32.mrb[13].mxu1  ;;  %v1323_v39 = vsub.s32 2, %v1314_v29 }
 0x178   : > { %v761_v43 = vpop.f32.mrb[14].mxu1  ;;  %v1306_v40 = vpop.permute.xlu0 %1305  ;;  %v1319_v42 = vsub.s32 1, %v1314_v29 }
 0x179   : > { %v1618_v44 = vpop.f32.mrb[15].mxu1 }
 0x17c   : > { %v717_v45 = vpop.f32.mrb[12].mxu0 }
 0x17d   : > { %v764_v46 = vadd.f32 %v717_v45, %v657_v35  ;;  %v719_v47 = vpop.f32.mrb[13].mxu0 }
 0x17e   : > { %v765_v48 = vadd.f32 %v719_v47, %v658_v37  ;;  %v721_v49 = vpop.f32.mrb[14].mxu0  ;;  %v865_v50 = vpop.f32.mrb[16].mxu1  ;;  %v1315_v37 = vsub.s32 0, %v1314_v29 }
 0x17f   : > { %v722_v51 = vpop.f32.mrb[15].mxu0  ;;  %v873_v52 = vadd.f32 %v865_v50, %v766_v41  ;;  %v1623_v53 = vpop.f32.mrb[17].mxu1  ;;  %v1311_v41 = vld [vmem:[%s1932_s5] sm:$0x7] }
 0x180   : > { %v868_v54 = vpop.f32.mrb[18].mxu1  ;;  %v1320_v50 = vrot.slane %v1311_v41, %v1319_v42 }
 0x181   : > { %v1624_v55 = vpop.f32.mrb[19].mxu1 }
 0x184   : > { %v824_v56 = vpop.f32.mrb[16].mxu0 }
 0x185   : > { %v871_v57 = vadd.f32 %v824_v56, %v764_v46  ;;  %v826_v58 = vpop.f32.mrb[17].mxu0  ;;  %v1316_v46 = vrot.slane %v1311_v41, %v1315_v37 }
 0x186   : > { %v872_v59 = vadd.f32 %v826_v58, %v765_v48  ;;  %v828_v60 = vpop.f32.mrb[18].mxu0  ;;  %v972_v61 = vpop.f32.mrb[20].mxu1  ;;  %v1324_v48 = vrot.slane %v1311_v41, %v1323_v39 }
 0x187   : > { %v829_v62 = vpop.f32.mrb[19].mxu0  ;;  %v980_v63 = vadd.f32 %v972_v61, %v873_v52  ;;  %v1629_v2 = vpop.f32.mrb[21].mxu1  ;;  %v1358_v61 = vld [vmem:[%s1930_s3] sm:$0xff] }
 0x188   : > { %v975_v3 = vpop.f32.mrb[22].mxu1 }
 0x189   : > { %v1630_v4 = vpop.f32.mrb[23].mxu1 }
 0x18c   : > { %v931_v5 = vpop.f32.mrb[20].mxu0 }
 0x18d   : > { %v978_v6 = vadd.f32 %v931_v5, %v871_v57  ;;  %v933_v7 = vpop.f32.mrb[21].mxu0 }
 0x18e   : > { %v979_v8 = vadd.f32 %v933_v7, %v872_v59  ;;  %v935_v9 = vpop.f32.mrb[22].mxu0  ;;  %v1079_v10 = vpop.f32.mrb[24].mxu1 }
 0x18f   : > { %v936_v11 = vpop.f32.mrb[23].mxu0  ;;  %v1087_v12 = vadd.f32 %v1079_v10, %v980_v63  ;;  %v1635_v13 = vpop.f32.mrb[25].mxu1 }
 0x190   : > { %v1082_v14 = vpop.f32.mrb[26].mxu1 }
 0x191   : > { %v1636_v15 = vpop.f32.mrb[27].mxu1  ;;  %v1367_v14 = vld [vmem:[%s1931_s4] sm:$0xff] }
 0x194   : > { %v1038_v0 = vpop.f32.mrb[24].mxu0 }
 0x195   : > { %v1085_v16 = vadd.f32 %v1038_v0, %v978_v6  ;;  %v1040_v17 = vpop.f32.mrb[25].mxu0 }
 0x196   : > { %v1086_v18 = vadd.f32 %v1040_v17, %v979_v8  ;;  %v1042_v19 = vpop.f32.mrb[26].mxu0  ;;  %v1186_v20 = vpop.f32.mrb[28].mxu1 }
 0x197   : > { %v1043_v21 = vpop.f32.mrb[27].mxu0  ;;  %v1194_v22 = vadd.f32 %v1186_v20, %v1087_v12  ;;  %v1641_v23 = vpop.f32.mrb[29].mxu1 }
 0x198   : > { %v1189_v24 = vpop.f32.mrb[30].mxu1 }
 0x199   : > { %v1642_v25 = vpop.f32.mrb[31].mxu1 }
 0x19c   : > { %v1145_v26 = vpop.f32.mrb[28].mxu0 }
 0x19d   : > { %v1192_v27 = vadd.f32 %v1145_v26, %v1085_v16  ;;  %v1147_v28 = vpop.f32.mrb[29].mxu0 }
 0x19e   : > { %v1193_v30 = vadd.f32 %v1147_v28, %v1086_v18  ;;  %v1149_v31 = vpop.f32.mrb[30].mxu0  ;;  %v1293_v32 = vpop.f32.mrb[32].mxu1 }
 0x19f   : > { %v1150_v33 = vpop.f32.mrb[31].mxu0  ;;  %v1301_v34 = vadd.f32 %v1293_v32, %v1194_v22  ;;  %v1647_v35 = vpop.f32.mrb[33].mxu1 }
 0x1a0   : > { %v1296_v36 = vpop.f32.mrb[34].mxu1 }
 0x1a1   : > { %v1648_v38 = vpop.f32.mrb[35].mxu1  ;;  %v1310_v44 = vadd.f32 %v1306_v40, %v1301_v34 }
 0x1a3   : > { %v1330_v56 = vmul.f32 %v1324_v48, %v1310_v44 }
 0x1a4   : > { %v1252_v43 = vpop.f32.mrb[32].mxu0 }
 0x1a5   : > { %v1299_v45 = vadd.f32 %v1252_v43, %v1192_v27  ;;  %v1254_v47 = vpop.f32.mrb[33].mxu0  ;;  %v1333_v59 = vsel %vm1332_vm11, %v1330_v56, 0.0 }
 0x1a6   : > { %v1300_v49 = vadd.f32 %v1254_v47, %v1193_v30  ;;  %v1256_v51 = vpop.f32.mrb[34].mxu0 }
 0x1a7   : > { %v1308_v52 = vadd.f32 %v1306_v40, %v1299_v45  ;;  %v1257_v53 = vpop.f32.mrb[35].mxu0 }
 0x1a8   : > { %v1309_v54 = vadd.f32 %v1306_v40, %v1300_v49 }
 0x1a9   : > { %v1328_v55 = vmul.f32 %v1316_v46, %v1308_v52 }
 0x1aa   : > { %v1329_v57 = vmul.f32 %v1320_v50, %v1309_v54 }
 0x1ac   : > { %v1331_v58 = vadd.f32 %v1329_v57, %v1328_v55 }
 0x1ae   : > { %v1334_v60 = vadd.f32 %v1333_v59, %v1331_v58 }
 0x1b0   : > { %1335 = vadd.xlane.f32.xlu1 %v1334_v60 }
 0x1c1   : > { %1361 = vperm.xlu1 %1687, %v1358_v61  }
 0x23d   : > { %v1336_v62 = vpop.xlane.xlu1 %1335 }
 0x23e   : > { %v1337_v63 = vmul.f32 0.00390625, %v1336_v62 }
 0x240   : > { %v1338_v2 = vsub.f32 %v1308_v52, %v1337_v63  ;;  %v1339_v3 = vsub.f32 %v1309_v54, %v1337_v63  ;;  %v1340_v4 = vsub.f32 %v1310_v44, %v1337_v63 }
 0x241   : > { %v1362_v18 = vpop.permute.xlu1 %1361 }
 0x242   : > { %v1341_v5 = vmul.f32 %v1338_v2, %v1316_v46  ;;  %v1342_v6 = vmul.f32 %v1339_v3, %v1320_v50  ;;  %v1343_v7 = vmul.f32 %v1340_v4, %v1324_v48 }
 0x244   : > { %v1344_v8 = vmul.f32 %v1341_v5, %v1341_v5  ;;  %v1345_v9 = vmul.f32 %v1342_v6, %v1342_v6  ;;  %v1346_v10 = vmul.f32 %v1343_v7, %v1343_v7 }
 0x246   : > { %v1347_v11 = vadd.f32 %v1345_v9, %v1344_v8  ;;  %v1348_v12 = vsel %vm1332_vm11, %v1346_v10, 0.0 }
 0x248   : > { %v1349_v13 = vadd.f32 %v1348_v12, %v1347_v11 }
 0x24a   : > { %1350 = vadd.xlane.f32.xlu0 %v1349_v13 }
 0x260   : > { %1370 = vperm.xlu0 %1686, %v1367_v14  }
 0x2d7   : > { %v1351_v15 = vpop.xlane.xlu0 %1350 }
 0x2d8   : > { %v1352_v0 = vmul.f32 0.00390625, %v1351_v15 }
 0x2da   : > { %v1353_v16 = vadd.f32 1e-05, %v1352_v0 }
 0x2dc   : > { %1691 = vrsqrt.f32 %v1353_v16 }
 0x2df   : > { %v1371_v25 = vpop.permute.xlu0 %1370 }
 0x2e6   : > { %v1692_v17 = vpop.eup %1691 }
 0x2e7   : > { %v1355_v19 = vmul.f32 %v1692_v17, %v1338_v2  ;;  %v1356_v20 = vmul.f32 %v1692_v17, %v1339_v3  ;;  %v1357_v21 = vmul.f32 %v1692_v17, %v1340_v4 }
 0x2e9   : > { %v1364_v22 = vmul.f32 %v1362_v18, %v1355_v19  ;;  %v1365_v23 = vmul.f32 %v1362_v18, %v1356_v20  ;;  %v1366_v24 = vmul.f32 %v1362_v18, %v1357_v21 }
 0x2eb   : > { %v1373_v1 = vadd.f32 %v1371_v25, %v1364_v22  ;;  %v1374_v26 = vadd.f32 %v1371_v25, %v1365_v23  ;;  %v1375_v27 = vadd.f32 %v1371_v25, %v1366_v24 }
 0x2ed   : > { %v1376_v28 = vmul.f32 %v1373_v1, %v1316_v46  ;;  %v1377_v29 = vmul.f32 %v1374_v26, %v1320_v50  ;;  %v1378_v30 = vmul.f32 %v1375_v27, %v1324_v48 }
 0x2ef   : > { %1379 = vst [vmem:[%s341_s26] sm:$0xff] %v1376_v28  ;;  %1380 = vst [vmem:[%s341_s26 + $0x8] sm:$0xff] %v1377_v29 }
 0x2f0   : > { %1381 = vst.msk [vmem:[%s341_s26 + $0x10] sm:$0xff] %vm1332_vm11, %v1378_v30 }
 0x2f1 PF: > { %s16_s23 = sadd.s32 1, %s1715_s23   ;;  %s1934_s21 = smov %s1711_s22 }
 0x2f2   : > { %p13_p5 = scmp.ge.s32.totalorder %s16_s23, 4   ;;  %s1935_s22 = smov %s1937_s24 }
 0x2f4   :  { %15 = sbr.rel (!%p13_p5) target bundleno = 2 (0x2), region = 94 }

// kernel: resblock_forward.2
= control target key start
LH: loop header
LB: loop body
LE: loop exit
PB: predicated region body
PF: predicated region fallthrough
CT: control target
= control target key end

     0   :  { %s1782_s21 = smov 0   ;;  %s1784_s22 = smov 0   ;;  %s1948_s0 = inlined_call_operand.vmem [shape: bf16[2,8,342], index: 0, kind: input, shape index: {}]   ;;  %s1949_s1 = inlined_call_operand.vmem [shape: bf16[9,8,8], index: 1, kind: input, shape index: {}]   ;;  %s1950_s2 = inlined_call_operand.vmem [shape: f32[8,1], index: 2, kind: input, shape index: {}]   ;;  %s1951_s3 = inlined_call_operand.vmem [shape: f32[8,1], index: 3, kind: input, shape index: {}]   ;;  %s1952_s4 = inlined_call_operand.vmem [shape: f32[8,1], index: 4, kind: input, shape index: {}]   ;;  %s1953_s5 = inlined_call_operand.vmem [shape: f32[1,288], index: 5, kind: input, shape index: {}]   ;;  %s1954_s6 = inlined_call_operand.vmem [shape: bf16[2,8,288], index: 6, kind: output, shape index: {}]  }
   0x1   :  { %s1786_s23 = smov 0  }
   0x2 LB: > { %s28_s24 = sadd.s32 1, %s1730_s22  ;;  %p1550_p0 = scmp.ge.s32.totalorder %s1734_s23, 1  ;;  %s1734_s23 = sphi %s1786_s23, %s16_s23   ;;  %s1730_s22 = sphi %s1784_s22, %s1956_s22   ;;  %s1726_s21 = sphi %s1782_s21, %s1955_s21  }
   0x3   : > { %p30_p1 = scmp.ge.s32.totalorder %s28_s24, 2  ;;  %p262_p2 = scmp.lt.s32.totalorder %s1734_s23, 3 }
   0x5   : > { %s1958_s24 = smov (%p30_p1, %s28_s24), 0  ;;  %p263_p3 = pnand %p1550_p0, %p262_p2 }
   0x6   : > { %p312_p4 = scmp.lt.s32.totalorder (!%p263_p3), %s1726_s21, 1  ;;  %v1736_v0 = vmov (!%p263_p3), 0.0   ;;  %vm1737_vm0 = vmmov (!%p263_p3), 0   ;;  %v1738_v1 = vmov (!%p263_p3), 0   ;;  %s1739_s29 = smov (!%p263_p3), 127   ;;  %v1302_v6 = vld [vmem:[%s1950_s2] sm:$0xff] (!%p263_p3) }
   0x7   : > { %266 = sbr.rel (%p263_p3) target bundleno = 756 (0x2f4), region = 44  ;;  %1615 = vmatprep.subr.bf16.mxu1 (!%p263_p3), %v1736_v0  ;;  %1617 = vmatprep.mubr.msk.bf16.mxu1 (!%p263_p3), %vm1737_vm0, %v1736_v0  ;;  %s1740_s30 = smov (!%p263_p3), 126   ;;  %vm369_vm1 = vcmask (!%p263_p3), 1043456   ;;  %v1553_v10 = vld [vmem:[%s1949_s1 + $0x4] sm:$0xf] (!%p263_p3)  ;;  %vm365_vm2 = vcmask (!%p263_p3), 64512  }
   0x8   : > { %411 = vmatprep.mubr.bf16.mxu0 (!%p263_p3), %v1738_v1  ;;  %1705 = vset.pattern.permute.xlu0 (!%p263_p3), %v1738_v1  ;;  %s1741_s7 = smov (!%p263_p3), 110   ;;  %s1742_s8 = smov (!%p263_p3), 109   ;;  %vm362_vm3 = vcmask (!%p263_p3), 1039360   ;;  %vm561_vm4 = vcmask (!%p263_p3), 1031168   ;;  %v345_v20 = vld [vmem:[%s1949_s1] sm:$0xf] (!%p263_p3) }
   0x9   : > { %1706 = vset.pattern.permute.xlu1 (!%p263_p3), %v1738_v1  ;;  %s1743_s9 = smov (!%p263_p3), 108   ;;  %s1744_s10 = smov (!%p263_p3), 92   ;;  %vm668_vm5 = vcmask (!%p263_p3), 900096   ;;  %v1563_v29 = vld [vmem:[%s1949_s1 + $0x8] sm:$0xf] (!%p263_p3)  ;;  %vm775_vm6 = vcmask (!%p263_p3), 891904  }
   0xa   : > { %s1745_s11 = smov (!%p263_p3), 91   ;;  %s1746_s12 = smov (!%p263_p3), 90   ;;  %v1567_v37 = vld [vmem:[%s1949_s1 + $0xc] sm:$0xf] (!%p263_p3)  ;;  %vm882_vm7 = vcmask (!%p263_p3), 883712   ;;  %vm989_vm8 = vcmask (!%p263_p3), 752640  }
   0xb   : > { %v1571_v45 = vld [vmem:[%s1949_s1 + $0x10] sm:$0xf] (!%p263_p3)  ;;  %v1575_v53 = vld [vmem:[%s1949_s1 + $0x14] sm:$0xf] (!%p263_p3)  ;;  %vm1096_vm9 = vcmask (!%p263_p3), 744448   ;;  %vm1203_vm10 = vcmask (!%p263_p3), 736256  }
   0xc   : > { %v1579_v61 = vld [vmem:[%s1949_s1 + $0x18] sm:$0xf] (!%p263_p3)  ;;  %vm1332_vm11 = vcmask (!%p263_p3), 261120   ;;  %vm1396_vm12 = vcmask (!%p263_p3), 257024  }
   0xe   : > { %s1960_s21 = smov (!%p312_p4, %s1726_s21), 1 }
   0xf   : > { %s1669_s25 = smul.u32 12, %s1960_s21 }
  0x11   : > { %s316_s28 = scalar_lea.vmem %s1948_s0, %s1669_s25  ;;  %s341_s27 = scalar_lea.vmem %s1954_s6, %s1669_s25 }
  0x12   : > { %v1707_v2 = vld [vmem:[%s316_s28 + $0x8] ss:$0 sps:$4 sm:$0xff]   ;;  %v343_v3 = vld [vmem:[%s316_s28] sm:$0xff] }
  0x13   : > { %v1554_v4 = vcombine.low %v343_v3, %v343_v3  ;;  %360 = vrot.lane.b32.xlu1 %v1707_v2, %s1739_s29  ;;  %v1555_v5 = vcombine.high %v343_v3, %v343_v3  ;;  %v470_v11 = vsel %vm369_vm1, %v1707_v2, 0 }
  0x15   : > { %356 = vrot.lane.b32.xlu0 %v1554_v4, %s1739_s29  ;;  %v464_v18 = vsel %vm369_vm1, %v1554_v4, 0 }
  0x17   : > { %555 = vrot.lane.b32.xlu1 %v1554_v4, %s1740_s30 }
  0x19   : > { %358 = vrot.lane.b32.xlu0 %v1555_v5, %s1739_s29 }
  0x1b   : > { %559 = vrot.lane.b32.xlu1 %v1707_v2, %s1740_s30 }
  0x1d   : > { %557 = vrot.lane.b32.xlu0 %v1555_v5, %s1740_s30 }
  0x1f   : > { %664 = vrot.lane.b32.xlu1 %v1555_v5, %s1741_s7 }
  0x21   : > { %662 = vrot.lane.b32.xlu0 %v1554_v4, %s1741_s7 }
  0x23   : > { %769 = vrot.lane.b32.xlu1 %v1554_v4, %s1742_s8 }
  0x25   : > { %666 = vrot.lane.b32.xlu0 %v1707_v2, %s1741_s7 }
  0x27   : > { %773 = vrot.lane.b32.xlu1 %v1707_v2, %s1742_s8 }
  0x29   : > { %771 = vrot.lane.b32.xlu0 %v1555_v5, %s1742_s8 }
  0x2b   : > { %878 = vrot.lane.b32.xlu1 %v1555_v5, %s1743_s9 }
  0x2d   : > { %876 = vrot.lane.b32.xlu0 %v1554_v4, %s1743_s9 }
  0x2f   : > { %983 = vrot.lane.b32.xlu1 %v1554_v4, %s1744_s10 }
  0x31   : > { %880 = vrot.lane.b32.xlu0 %v1707_v2, %s1743_s9 }
  0x33   : > { %987 = vrot.lane.b32.xlu1 %v1707_v2, %s1744_s10 }
  0x35   : > { %985 = vrot.lane.b32.xlu0 %v1555_v5, %s1744_s10 }
  0x37   : > { %1092 = vrot.lane.b32.xlu1 %v1555_v5, %s1745_s11 }
  0x39   : > { %1090 = vrot.lane.b32.xlu0 %v1554_v4, %s1745_s11 }
  0x3b   : > { %1197 = vrot.lane.b32.xlu1 %v1554_v4, %s1746_s12 }
  0x3d   : > { %1094 = vrot.lane.b32.xlu0 %v1707_v2, %s1745_s11 }
  0x3f   : > { %1201 = vrot.lane.b32.xlu1 %v1707_v2, %s1746_s12 }
  0x41   : > { %1199 = vrot.lane.b32.xlu0 %v1555_v5, %s1746_s12 }
  0x45   : > { %1305 = vperm.xlu0 %1705, %v1302_v6   ;;  %v1583_v6 = vld [vmem:[%s1949_s1 + $0x1c] sm:$0xf] }
  0x85   : > { %v361_v7 = vpop.permute.xlu1 %360 }
  0x86   : > { %v377_v9 = vsel %vm369_vm1, %v361_v7, 0 }
  0x87   : > { %v357_v8 = vpop.permute.xlu0 %356  ;;  %1616 = vmatpush3.bf16.msra.mxu1 %v377_v9 }
  0x88   : > { %1621 = vmatprep.subr.bf16.mxu1 %v1736_v0 }
  0x89   : > { %v556_v12 = vpop.permute.xlu1 %555 }
  0x8a   : > { %1618 = vmatmul.mubr.msk.bf16.vlgmr.msra.gmra.mrb[0].mxu1 %vm365_vm2, %v1553_v10 }
  0x8b   : > { %v359_v13 = vpop.permute.xlu0 %358  ;;  %1622 = vmatpush3.bf16.msra.mxu1 %v470_v11  ;;  %1623 = vmatprep.mubr.msk.bf16.mxu1 %vm1737_vm0, %v1736_v0  ;;  %v1587_v11 = vld [vmem:[%s1949_s1 + $0x20] sm:$0xf] }
  0x8c   : > { %v364_v14 = vsel %vm362_vm3, %v359_v13, %v361_v7  ;;  %v363_v15 = vsel %vm362_vm3, %v357_v8, %v359_v13  ;;  %1627 = vmatprep.subr.bf16.mxu1 %v1736_v0 }
  0x8d   : > { %1557 = vmatprep.subr.msk.bf16.mxu0 %vm369_vm1, %v364_v14  ;;  %v371_v16 = vsel %vm369_vm1, %v363_v15, 0  ;;  %v560_v17 = vpop.permute.xlu1 %559 }
  0x8e   : > { %380 = vmatpush1.bf16.msra.mxu0 %v371_v16  ;;  %v574_v22 = vsel %vm369_vm1, %v560_v17, 0 }
  0x8f   : > { %1560 = vmatprep.subr.msk.bf16.mxu0 %vm369_vm1, %v1555_v5  ;;  %v558_v19 = vpop.permute.xlu0 %557 }
  0x90   : > { %v563_v21 = vsel %vm561_vm4, %v558_v19, %v560_v17  ;;  %v562_v25 = vsel %vm561_vm4, %v556_v12, %v558_v19 }
  0x91   : > { %1558 = vmatmul.mubr.msk.bf16.vlgmr.msra.gmra.mrb[0].mxu0 %vm365_vm2, %v1553_v10  ;;  %v665_v23 = vpop.permute.xlu1 %664  ;;  %v568_v26 = vsel %vm369_vm1, %v562_v25, 0 }
  0x92   : > { %473 = vmatpush1.bf16.msra.mxu0 %v464_v18  ;;  %504 = vmatprep.mubr.bf16.mxu0 %v1738_v1 }
  0x93   : > { %1624 = vmatmul.mubr.msk.bf16.vlgmr.msra.gmra.mrb[4].mxu1 %vm365_vm2, %v345_v20  ;;  %1564 = vmatprep.subr.msk.bf16.mxu0 %vm369_vm1, %v563_v21  ;;  %v663_v24 = vpop.permute.xlu0 %662 }
  0x94   : > { %1628 = vmatpush3.bf16.msra.mxu1 %v574_v22  ;;  %1629 = vmatprep.mubr.msk.bf16.mxu1 %vm1737_vm0, %v1736_v0  ;;  %v669_v33 = vsel %vm668_vm5, %v663_v24, %v665_v23 }
  0x95   : > { %1633 = vmatprep.subr.bf16.mxu1 %v1736_v0  ;;  %v770_v28 = vpop.permute.xlu1 %769  ;;  %v675_v35 = vsel %vm369_vm1, %v669_v33, 0 }
  0x97   : > { %v667_v27 = vpop.permute.xlu0 %666 }
  0x98   : > { %v670_v30 = vsel %vm668_vm5, %v665_v23, %v667_v27  ;;  %v681_v31 = vsel %vm369_vm1, %v667_v27, 0 }
  0x99   : > { %1561 = vmatmul.mubr.msk.bf16.vlgmr.msra.gmra.mrb[4].mxu0 %vm365_vm2, %v345_v20  ;;  %v774_v34 = vpop.permute.xlu1 %773 }
  0x9a   : > { %577 = vmatpush1.bf16.msra.mxu0 %v568_v26  ;;  %608 = vmatprep.mubr.bf16.mxu0 %v1738_v1  ;;  %v788_v39 = vsel %vm369_vm1, %v774_v34, 0 }
  0x9b   : > { %1630 = vmatmul.mubr.msk.bf16.vlgmr.msra.gmra.mrb[8].mxu1 %vm365_vm2, %v1563_v29  ;;  %1568 = vmatprep.subr.msk.bf16.mxu0 %vm369_vm1, %v670_v30  ;;  %v772_v32 = vpop.permute.xlu0 %771 }
  0x9c   : > { %1634 = vmatpush3.bf16.msra.mxu1 %v681_v31  ;;  %1635 = vmatprep.mubr.msk.bf16.mxu1 %vm1737_vm0, %v1736_v0  ;;  %v777_v38 = vsel %vm775_vm6, %v772_v32, %v774_v34  ;;  %v776_v41 = vsel %vm775_vm6, %v770_v28, %v772_v32 }
  0x9d   : > { %1639 = vmatprep.subr.bf16.mxu1 %v1736_v0  ;;  %v879_v40 = vpop.permute.xlu1 %878  ;;  %v782_v43 = vsel %vm369_vm1, %v776_v41, 0 }
  0x9f   : > { %v877_v36 = vpop.permute.xlu0 %876 }
  0xa0   : > { %v883_v49 = vsel %vm882_vm7, %v877_v36, %v879_v40 }
  0xa1   : > { %1565 = vmatmul.mubr.msk.bf16.vlgmr.msra.gmra.mrb[8].mxu0 %vm365_vm2, %v1563_v29  ;;  %v984_v44 = vpop.permute.xlu1 %983  ;;  %v889_v51 = vsel %vm369_vm1, %v883_v49, 0 }
  0xa2   : > { %684 = vmatpush1.bf16.msra.mxu0 %v675_v35  ;;  %715 = vmatprep.mubr.bf16.mxu0 %v1738_v1 }
  0xa3   : > { %1636 = vmatmul.mubr.msk.bf16.vlgmr.msra.gmra.mrb[12].mxu1 %vm365_vm2, %v1567_v37  ;;  %1572 = vmatprep.subr.msk.bf16.mxu0 %vm369_vm1, %v777_v38  ;;  %v881_v42 = vpop.permute.xlu0 %880 }
  0xa4   : > { %1640 = vmatpush3.bf16.msra.mxu1 %v788_v39  ;;  %1641 = vmatprep.mubr.msk.bf16.mxu1 %vm1737_vm0, %v1736_v0  ;;  %v884_v46 = vsel %vm882_vm7, %v879_v40, %v881_v42  ;;  %v895_v47 = vsel %vm369_vm1, %v881_v42, 0 }
  0xa5   : > { %1645 = vmatprep.subr.bf16.mxu1 %v1736_v0  ;;  %v988_v50 = vpop.permute.xlu1 %987 }
  0xa6   : > { %v1002_v55 = vsel %vm369_vm1, %v988_v50, 0 }
  0xa7   : > { %v986_v48 = vpop.permute.xlu0 %985 }
  0xa8   : > { %v991_v54 = vsel %vm989_vm8, %v986_v48, %v988_v50  ;;  %v990_v57 = vsel %vm989_vm8, %v984_v44, %v986_v48 }
  0xa9   : > { %1569 = vmatmul.mubr.msk.bf16.vlgmr.msra.gmra.mrb[12].mxu0 %vm365_vm2, %v1567_v37  ;;  %v1093_v56 = vpop.permute.xlu1 %1092  ;;  %v996_v59 = vsel %vm369_vm1, %v990_v57, 0 }
  0xaa   : > { %791 = vmatpush1.bf16.msra.mxu0 %v782_v43  ;;  %822 = vmatprep.mubr.bf16.mxu0 %v1738_v1 }
  0xab   : > { %1642 = vmatmul.mubr.msk.bf16.vlgmr.msra.gmra.mrb[16].mxu1 %vm365_vm2, %v1571_v45  ;;  %1576 = vmatprep.subr.msk.bf16.mxu0 %vm369_vm1, %v884_v46  ;;  %v1091_v52 = vpop.permute.xlu0 %1090 }
  0xac   : > { %1646 = vmatpush3.bf16.msra.mxu1 %v895_v47  ;;  %1647 = vmatprep.mubr.msk.bf16.mxu1 %vm1737_vm0, %v1736_v0  ;;  %v1097_v2 = vsel %vm1096_vm9, %v1091_v52, %v1093_v56 }
  0xad   : > { %1651 = vmatprep.subr.bf16.mxu1 %v1736_v0  ;;  %v1198_v60 = vpop.permute.xlu1 %1197  ;;  %v1103_v5 = vsel %vm369_vm1, %v1097_v2, 0 }
  0xaf   : > { %v1095_v58 = vpop.permute.xlu0 %1094 }
  0xb0   : > { %v1098_v62 = vsel %vm1096_vm9, %v1093_v56, %v1095_v58  ;;  %v1109_v63 = vsel %vm369_vm1, %v1095_v58, 0 }
  0xb1   : > { %1573 = vmatmul.mubr.msk.bf16.vlgmr.msra.gmra.mrb[16].mxu0 %vm365_vm2, %v1571_v45  ;;  %v1202_v4 = vpop.permute.xlu1 %1201 }
  0xb2   : > { %898 = vmatpush1.bf16.msra.mxu0 %v889_v51  ;;  %929 = vmatprep.mubr.bf16.mxu0 %v1738_v1  ;;  %v1216_v8 = vsel %vm369_vm1, %v1202_v4, 0 }
  0xb3   : > { %1648 = vmatmul.mubr.msk.bf16.vlgmr.msra.gmra.mrb[20].mxu1 %vm365_vm2, %v1575_v53  ;;  %1580 = vmatprep.subr.msk.bf16.mxu0 %vm369_vm1, %v991_v54  ;;  %v1200_v3 = vpop.permute.xlu0 %1199 }
  0xb4   : > { %1652 = vmatpush3.bf16.msra.mxu1 %v1002_v55  ;;  %1653 = vmatprep.mubr.msk.bf16.mxu1 %vm1737_vm0, %v1736_v0  ;;  %v1205_v7 = vsel %vm1203_vm10, %v1200_v3, %v1202_v4  ;;  %v1204_v9 = vsel %vm1203_vm10, %v1198_v60, %v1200_v3 }
  0xb5   : > { %1657 = vmatprep.subr.bf16.mxu1 %v1736_v0  ;;  %v1210_v10 = vsel %vm369_vm1, %v1204_v9, 0 }
  0xb9   : > { %1577 = vmatmul.mubr.msk.bf16.vlgmr.msra.gmra.mrb[20].mxu0 %vm365_vm2, %v1575_v53 }
  0xba   : > { %1005 = vmatpush1.bf16.msra.mxu0 %v996_v59  ;;  %1036 = vmatprep.mubr.bf16.mxu0 %v1738_v1 }
  0xbb   : > { %1654 = vmatmul.mubr.msk.bf16.vlgmr.msra.gmra.mrb[24].mxu1 %vm365_vm2, %v1579_v61  ;;  %1584 = vmatprep.subr.msk.bf16.mxu0 %vm369_vm1, %v1098_v62 }
  0xbc   : > { %1658 = vmatpush3.bf16.msra.mxu1 %v1109_v63  ;;  %1659 = vmatprep.mubr.msk.bf16.mxu1 %vm1737_vm0, %v1736_v0 }
  0xbd   : > { %1663 = vmatprep.subr.bf16.mxu1 %v1736_v0 }
  0xc1   : > { %1581 = vmatmul.mubr.msk.bf16.vlgmr.msra.gmra.mrb[24].mxu0 %vm365_vm2, %v1579_v61 }
  0xc2   : > { %1112 = vmatpush1.bf16.msra.mxu0 %v1103_v5  ;;  %1143 = vmatprep.mubr.bf16.mxu0 %v1738_v1 }
  0xc3   : > { %1660 = vmatmul.mubr.msk.bf16.vlgmr.msra.gmra.mrb[28].mxu1 %vm365_vm2, %v1583_v6  ;;  %1588 = vmatprep.subr.msk.bf16.mxu0 %vm369_vm1, %v1205_v7 }
  0xc4   : > { %1664 = vmatpush3.bf16.msra.mxu1 %v1216_v8  ;;  %1665 = vmatprep.mubr.msk.bf16.mxu1 %vm1737_vm0, %v1736_v0 }
  0xc9   : > { %1585 = vmatmul.mubr.msk.bf16.vlgmr.msra.gmra.mrb[28].mxu0 %vm365_vm2, %v1583_v6 }
  0xca   : > { %1219 = vmatpush1.bf16.msra.mxu0 %v1210_v10  ;;  %1250 = vmatprep.mubr.bf16.mxu0 %v1738_v1 }
  0xcb   : > { %1666 = vmatmul.mubr.msk.bf16.vlgmr.msra.gmra.mrb[32].mxu1 %vm365_vm2, %v1587_v11 }
  0xd1   : > { %1589 = vmatmul.mubr.msk.bf16.vlgmr.msra.gmra.mrb[32].mxu0 %vm365_vm2, %v1587_v11 }
 0x15d   : > { %v454_v12 = vpop.f32.mrb[0].mxu1 }
 0x15e   : > { %v1619_v13 = vpop.f32.mrb[1].mxu1 }
 0x15f   : > { %v457_v14 = vpop.f32.mrb[2].mxu1 }
 0x160   : > { %v1620_v15 = vpop.f32.mrb[3].mxu1 }
 0x164   : > { %v413_v0 = vpop.f32.mrb[0].mxu0 }
 0x165   : > { %v415_v16 = vpop.f32.mrb[1].mxu0 }
 0x166   : > { %v417_v17 = vpop.f32.mrb[2].mxu0  ;;  %v547_v18 = vpop.f32.mrb[4].mxu1 }
 0x167   : > { %v418_v19 = vpop.f32.mrb[3].mxu0  ;;  %v548_v20 = vadd.f32 %v547_v18, %v454_v12  ;;  %v1625_v21 = vpop.f32.mrb[5].mxu1 }
 0x168   : > { %v550_v22 = vpop.f32.mrb[6].mxu1 }
 0x169   : > { %v1626_v23 = vpop.f32.mrb[7].mxu1 }
 0x16c   : > { %v506_v24 = vpop.f32.mrb[4].mxu0 }
 0x16d   : > { %v507_v25 = vadd.f32 %v506_v24, %v413_v0  ;;  %v508_v1 = vpop.f32.mrb[5].mxu0 }
 0x16e   : > { %v509_v26 = vadd.f32 %v508_v1, %v415_v16  ;;  %v510_v27 = vpop.f32.mrb[6].mxu0  ;;  %v651_v28 = vpop.f32.mrb[8].mxu1  ;;  %v1313_v1 = vlaneseq }
 0x16f   : > { %v511_v29 = vpop.f32.mrb[7].mxu0  ;;  %v659_v30 = vadd.f32 %v651_v28, %v548_v20  ;;  %v1631_v31 = vpop.f32.mrb[9].mxu1 }
 0x170   : > { %v654_v32 = vpop.f32.mrb[10].mxu1  ;;  %v1314_v29 = vshrl.u32 %v1313_v1, 7 }
 0x171   : > { %v1632_v33 = vpop.f32.mrb[11].mxu1 }
 0x174   : > { %v610_v34 = vpop.f32.mrb[8].mxu0 }
 0x175   : > { %v657_v35 = vadd.f32 %v610_v34, %v507_v25  ;;  %v612_v36 = vpop.f32.mrb[9].mxu0 }
 0x176   : > { %v658_v37 = vadd.f32 %v612_v36, %v509_v26  ;;  %v614_v38 = vpop.f32.mrb[10].mxu0  ;;  %v758_v39 = vpop.f32.mrb[12].mxu1 }
 0x177   : > { %v615_v40 = vpop.f32.mrb[11].mxu0  ;;  %v766_v41 = vadd.f32 %v758_v39, %v659_v30  ;;  %v1637_v42 = vpop.f32.mrb[13].mxu1  ;;  %v1323_v39 = vsub.s32 2, %v1314_v29 }
 0x178   : > { %v761_v43 = vpop.f32.mrb[14].mxu1  ;;  %v1306_v40 = vpop.permute.xlu0 %1305  ;;  %v1319_v42 = vsub.s32 1, %v1314_v29 }
 0x179   : > { %v1638_v44 = vpop.f32.mrb[15].mxu1 }
 0x17c   : > { %v717_v45 = vpop.f32.mrb[12].mxu0 }
 0x17d   : > { %v764_v46 = vadd.f32 %v717_v45, %v657_v35  ;;  %v719_v47 = vpop.f32.mrb[13].mxu0 }
 0x17e   : > { %v765_v48 = vadd.f32 %v719_v47, %v658_v37  ;;  %v721_v49 = vpop.f32.mrb[14].mxu0  ;;  %v865_v50 = vpop.f32.mrb[16].mxu1  ;;  %v1315_v37 = vsub.s32 0, %v1314_v29 }
 0x17f   : > { %v722_v51 = vpop.f32.mrb[15].mxu0  ;;  %v873_v52 = vadd.f32 %v865_v50, %v766_v41  ;;  %v1643_v53 = vpop.f32.mrb[17].mxu1  ;;  %v1311_v41 = vld [vmem:[%s1953_s5] sm:$0x7] }
 0x180   : > { %v868_v54 = vpop.f32.mrb[18].mxu1  ;;  %v1320_v50 = vrot.slane %v1311_v41, %v1319_v42 }
 0x181   : > { %v1644_v55 = vpop.f32.mrb[19].mxu1 }
 0x184   : > { %v824_v56 = vpop.f32.mrb[16].mxu0 }
 0x185   : > { %v871_v57 = vadd.f32 %v824_v56, %v764_v46  ;;  %v826_v58 = vpop.f32.mrb[17].mxu0  ;;  %v1316_v46 = vrot.slane %v1311_v41, %v1315_v37 }
 0x186   : > { %v872_v59 = vadd.f32 %v826_v58, %v765_v48  ;;  %v828_v60 = vpop.f32.mrb[18].mxu0  ;;  %v972_v61 = vpop.f32.mrb[20].mxu1  ;;  %v1324_v48 = vrot.slane %v1311_v41, %v1323_v39 }
 0x187   : > { %v829_v62 = vpop.f32.mrb[19].mxu0  ;;  %v980_v63 = vadd.f32 %v972_v61, %v873_v52  ;;  %v1649_v2 = vpop.f32.mrb[21].mxu1  ;;  %v1358_v61 = vld [vmem:[%s1951_s3] sm:$0xff] }
 0x188   : > { %v975_v3 = vpop.f32.mrb[22].mxu1 }
 0x189   : > { %v1650_v4 = vpop.f32.mrb[23].mxu1 }
 0x18c   : > { %v931_v5 = vpop.f32.mrb[20].mxu0 }
 0x18d   : > { %v978_v6 = vadd.f32 %v931_v5, %v871_v57  ;;  %v933_v7 = vpop.f32.mrb[21].mxu0 }
 0x18e   : > { %v979_v8 = vadd.f32 %v933_v7, %v872_v59  ;;  %v935_v9 = vpop.f32.mrb[22].mxu0  ;;  %v1079_v10 = vpop.f32.mrb[24].mxu1 }
 0x18f   : > { %v936_v11 = vpop.f32.mrb[23].mxu0  ;;  %v1087_v12 = vadd.f32 %v1079_v10, %v980_v63  ;;  %v1655_v13 = vpop.f32.mrb[25].mxu1 }
 0x190   : > { %v1082_v14 = vpop.f32.mrb[26].mxu1 }
 0x191   : > { %v1656_v15 = vpop.f32.mrb[27].mxu1  ;;  %v1367_v14 = vld [vmem:[%s1952_s4] sm:$0xff] }
 0x194   : > { %v1038_v0 = vpop.f32.mrb[24].mxu0 }
 0x195   : > { %v1085_v16 = vadd.f32 %v1038_v0, %v978_v6  ;;  %v1040_v17 = vpop.f32.mrb[25].mxu0 }
 0x196   : > { %v1086_v18 = vadd.f32 %v1040_v17, %v979_v8  ;;  %v1042_v19 = vpop.f32.mrb[26].mxu0  ;;  %v1186_v20 = vpop.f32.mrb[28].mxu1 }
 0x197   : > { %v1043_v21 = vpop.f32.mrb[27].mxu0  ;;  %v1194_v22 = vadd.f32 %v1186_v20, %v1087_v12  ;;  %v1661_v23 = vpop.f32.mrb[29].mxu1 }
 0x198   : > { %v1189_v24 = vpop.f32.mrb[30].mxu1 }
 0x199   : > { %v1662_v25 = vpop.f32.mrb[31].mxu1 }
 0x19c   : > { %v1145_v26 = vpop.f32.mrb[28].mxu0 }
 0x19d   : > { %v1192_v27 = vadd.f32 %v1145_v26, %v1085_v16  ;;  %v1147_v28 = vpop.f32.mrb[29].mxu0 }
 0x19e   : > { %v1193_v30 = vadd.f32 %v1147_v28, %v1086_v18  ;;  %v1149_v31 = vpop.f32.mrb[30].mxu0  ;;  %v1293_v32 = vpop.f32.mrb[32].mxu1 }
 0x19f   : > { %v1150_v33 = vpop.f32.mrb[31].mxu0  ;;  %v1301_v34 = vadd.f32 %v1293_v32, %v1194_v22  ;;  %v1667_v35 = vpop.f32.mrb[33].mxu1 }
 0x1a0   : > { %v1296_v36 = vpop.f32.mrb[34].mxu1 }
 0x1a1   : > { %v1668_v38 = vpop.f32.mrb[35].mxu1  ;;  %v1310_v44 = vadd.f32 %v1306_v40, %v1301_v34 }
 0x1a3   : > { %v1330_v56 = vmul.f32 %v1324_v48, %v1310_v44 }
 0x1a4   : > { %v1252_v43 = vpop.f32.mrb[32].mxu0 }
 0x1a5   : > { %v1299_v45 = vadd.f32 %v1252_v43, %v1192_v27  ;;  %v1254_v47 = vpop.f32.mrb[33].mxu0  ;;  %v1333_v59 = vsel %vm1332_vm11, %v1330_v56, 0.0 }
 0x1a6   : > { %v1300_v49 = vadd.f32 %v1254_v47, %v1193_v30  ;;  %v1256_v51 = vpop.f32.mrb[34].mxu0 }
 0x1a7   : > { %v1308_v52 = vadd.f32 %v1306_v40, %v1299_v45  ;;  %v1257_v53 = vpop.f32.mrb[35].mxu0 }
 0x1a8   : > { %v1309_v54 = vadd.f32 %v1306_v40, %v1300_v49 }
 0x1a9   : > { %v1328_v55 = vmul.f32 %v1316_v46, %v1308_v52 }
 0x1aa   : > { %v1329_v57 = vmul.f32 %v1320_v50, %v1309_v54 }
 0x1ac   : > { %v1331_v58 = vadd.f32 %v1329_v57, %v1328_v55 }
 0x1ae   : > { %v1334_v60 = vadd.f32 %v1333_v59, %v1331_v58 }
 0x1b0   : > { %1335 = vadd.xlane.f32.xlu1 %v1334_v60 }
 0x1c1   : > { %1361 = vperm.xlu1 %1706, %v1358_v61  }
 0x23d   : > { %v1336_v62 = vpop.xlane.xlu1 %1335 }
 0x23e   : > { %v1337_v63 = vmul.f32 0.00390625, %v1336_v62 }
 0x240   : > { %v1338_v2 = vsub.f32 %v1308_v52, %v1337_v63  ;;  %v1339_v3 = vsub.f32 %v1309_v54, %v1337_v63  ;;  %v1340_v4 = vsub.f32 %v1310_v44, %v1337_v63 }
 0x241   : > { %v1362_v18 = vpop.permute.xlu1 %1361 }
 0x242   : > { %v1341_v5 = vmul.f32 %v1338_v2, %v1316_v46  ;;  %v1342_v6 = vmul.f32 %v1339_v3, %v1320_v50  ;;  %v1343_v7 = vmul.f32 %v1340_v4, %v1324_v48 }
 0x244   : > { %v1344_v8 = vmul.f32 %v1341_v5, %v1341_v5  ;;  %v1345_v9 = vmul.f32 %v1342_v6, %v1342_v6  ;;  %v1346_v10 = vmul.f32 %v1343_v7, %v1343_v7 }
 0x246   : > { %v1347_v11 = vadd.f32 %v1345_v9, %v1344_v8  ;;  %v1348_v12 = vsel %vm1332_vm11, %v1346_v10, 0.0 }
 0x248   : > { %v1349_v13 = vadd.f32 %v1348_v12, %v1347_v11 }
 0x24a   : > { %1350 = vadd.xlane.f32.xlu0 %v1349_v13 }
 0x260   : > { %1370 = vperm.xlu0 %1705, %v1367_v14  }
 0x2d7   : > { %v1351_v15 = vpop.xlane.xlu0 %1350 }
 0x2d8   : > { %v1352_v0 = vmul.f32 0.00390625, %v1351_v15 }
 0x2da   : > { %v1353_v16 = vadd.f32 1e-05, %v1352_v0 }
 0x2dc   : > { %1710 = vrsqrt.f32 %v1353_v16 }
 0x2df   : > { %v1371_v25 = vpop.permute.xlu0 %1370 }
 0x2e6   : > { %v1711_v17 = vpop.eup %1710 }
 0x2e7   : > { %v1355_v19 = vmul.f32 %v1711_v17, %v1338_v2  ;;  %v1356_v20 = vmul.f32 %v1711_v17, %v1339_v3  ;;  %v1357_v21 = vmul.f32 %v1711_v17, %v1340_v4 }
 0x2e9   : > { %v1364_v22 = vmul.f32 %v1362_v18, %v1355_v19  ;;  %v1365_v23 = vmul.f32 %v1362_v18, %v1356_v20  ;;  %v1366_v24 = vmul.f32 %v1362_v18, %v1357_v21 }
 0x2eb   : > { %v1373_v1 = vadd.f32 %v1371_v25, %v1364_v22  ;;  %v1374_v26 = vadd.f32 %v1371_v25, %v1365_v23  ;;  %v1375_v27 = vadd.f32 %v1371_v25, %v1366_v24 }
 0x2ed   : > { %v1376_v28 = vmax.f32 %v1373_v1, 0.0  ;;  %v1377_v29 = vmax.f32 %v1374_v26, 0.0  ;;  %v1378_v30 = vmax.f32 %v1375_v27, 0.0 }
 0x2ef   : > { %v1379_v31 = vmul.f32 %v1376_v28, %v1316_v46  ;;  %v1380_v32 = vmul.f32 %v1377_v29, %v1320_v50  ;;  %v1381_v33 = vmul.f32 %v1378_v30, %v1324_v48 }
 0x2f1   : > { %v1595_v34 = vpack.c.bf16 %v1380_v32, %v1379_v31  ;;  %v1596_v35 = vpack.c.bf16 %v1381_v33, %v1381_v33 }
 0x2f3   : > { %1395 = vst [vmem:[%s341_s27] sm:$0xff] %v1595_v34  ;;  %1397 = vst.msk [vmem:[%s341_s27 + $0x8] sm:$0xf] %vm1396_vm12, %v1596_v35 }
 0x2f4 PF: > { %s16_s23 = sadd.s32 1, %s1734_s23   ;;  %s1955_s21 = smov %s1730_s22 }
 0x2f5   : > { %p13_p5 = scmp.ge.s32.totalorder %s16_s23, 4   ;;  %s1956_s22 = smov %s1958_s24 }
 0x2f7   :  { %15 = sbr.rel (!%p13_p5) target bundleno = 2 (0x2), region = 94 }

</bundles_post_ra>
